<compile_context>
chip_gen: v7x
topology: tpu7x:2x2x1
jax: 0.10.0
libtpu: 0.0.40
codegen_flags: <defaults>
</compile_context>

<pallas_src>
import numpy as np
import jax
import jax.numpy as jnp
from jax.experimental import pallas as pl
from jax.experimental.pallas import tpu as pltpu


# ---------------------------------------------------------------------------
# Operator setup (numpy, done once per (H, W))
# ---------------------------------------------------------------------------

def _upfirdn1d_matrix(n_in, k, up, down, pad0, pad1):
    """Dense matrix of a 1-D upfirdn (zero-upsample, pad, true-convolve, downsample)."""
    k = np.asarray(k, np.float64)
    kk = k.shape[0]
    n_out = (n_in * up + pad0 + pad1 - kk) // down + 1
    M = np.zeros((n_out, n_in), np.float64)
    for i in range(n_out):
        for a in range(kk):
            p = i * down + a - pad0          # index into zero-upsampled signal
            if p < 0 or p >= n_in * up or (p % up) != 0:
                continue
            M[i, p // up] += k[kk - 1 - a]   # true convolution (flipped kernel)
    return M


def _build_operators(H, W):
    """Composite (dwt o blur-down o iwt) separable operators."""
    s = 1.0 / np.sqrt(2.0)
    l = np.array([s, s])
    h = np.array([-s, s])
    # InverseHaarTransform buffers: ll, -lh, -hl, hh -> separable (row, col) factors
    iwt_rc = [(l, l), (-h, l), (l, -h), (h, h)]
    # HaarTransform buffers: ll, lh, hl, hh
    dwt_rc = [(l, l), (h, l), (l, h), (h, h)]
    b = np.array([1.0, 3.0, 3.0, 1.0])
    b = b / b.sum()

    BlurR = _upfirdn1d_matrix(2 * H, b, up=1, down=2, pad0=1, pad1=1)   # (H, 2H)
    BlurC = _upfirdn1d_matrix(2 * W, b, up=1, down=2, pad0=1, pad1=1)   # (W, 2W)

    M_row = np.zeros((4, 4, H // 2, H), np.float64)
    M_colT = np.zeros((4, 4, W, W // 2), np.float64)
    for t in range(4):
        Dr = _upfirdn1d_matrix(H, dwt_rc[t][0], up=1, down=2, pad0=0, pad1=0)
        Dc = _upfirdn1d_matrix(W, dwt_rc[t][1], up=1, down=2, pad0=0, pad1=0)
        for si in range(4):
            Ir = _upfirdn1d_matrix(H, iwt_rc[si][0], up=2, down=1, pad0=1, pad1=0)
            Ic = _upfirdn1d_matrix(W, iwt_rc[si][1], up=2, down=1, pad0=1, pad1=0)
            M_row[t, si] = Dr @ BlurR @ Ir
            M_colT[t, si] = (Dc @ BlurC @ Ic).T
    return M_row, M_colT


# ---------------------------------------------------------------------------
# Pallas kernel
# ---------------------------------------------------------------------------

def _fromrgb_body(x_ref, mcol_ref, mrow_ref, w_ref, skip_ref, xout_ref, out_ref):
    # x_ref:    (bt, 4, H, W)  f32   NCHW batch tile (no wrapper transpose)
    # mcol_ref: (4, 4, W, W2)  f32   mcol_ref[t, s] = M_colT[t, s]
    # mrow_ref: (4, 4, H2, H)  f32   mrow_ref[t, s] = M_row[t, s]
    # w_ref:    (C, 4)         f32   EqualConv2d weight * 0.5 (scale pre-folded)
    # skip_ref: (bt, C, K) or None
    # xout_ref: (bt, 4, K)           wavelet-domain x (lane-dense K = H2*W2)
    # out_ref:  (bt, C, K)
    bt, _, H, W = x_ref.shape
    H2 = mrow_ref.shape[2]
    W2 = mcol_ref.shape[3]
    C = w_ref.shape[0]
    K = H2 * W2

    # Load the four input subbands once; (bt, H, W) -> (bt*H, W) merges leading
    # dims only (batch folded into the matmul M dimension).
    xs = [x_ref[:, s].reshape(bt * H, W) for s in range(4)]

    # Wavelet-domain output, one output subband t at a time.
    zs = []
    for t in range(4):
        acc = jnp.zeros((bt, H2, W2), jnp.float32)
        for s in range(4):
            # Stage A (composite column operator): unbatched (bt*H, W) @ (W, W2).
            y = jnp.dot(xs[s], mcol_ref[t, s],
                        preferred_element_type=jnp.float32)          # (bt*H, W2)
            y = y.reshape(bt, H, W2)
            # Stage B (composite row operator), batched over the batch tile.
            # Batched (not unbatched) because batch rides on the sublane axis of
            # the NCHW input; the alternative is a full relayout of the
            # intermediate, which costs more than the small operator broadcast.
            lhs = jnp.broadcast_to(mrow_ref[t, s], (bt, H2, H))
            acc = acc + jnp.einsum('bmh,bhn->bmn', lhs, y,
                                   preferred_element_type=jnp.float32)
        zs.append(acc.reshape(bt, K))                                 # (bt, K)

    xo = jnp.stack(zs, axis=1)                                        # (bt, 4, K)
    xout_ref[...] = xo.astype(xout_ref.dtype)

    # EqualConv2d(4, C, 1, bias=False) + LeakyReLU(0.2) as one batched matmul
    # on the lane-dense slab (single pass over the big output tensor).
    wb = jnp.broadcast_to(w_ref[...], (bt, C, 4))
    o = jnp.einsum('bct,btk->bck', wb, xo,
                   preferred_element_type=jnp.float32)                # (bt, C, K)
    o = jnp.where(o >= 0.0, o, 0.2 * o)                               # LeakyReLU(0.2)
    if skip_ref is not None:
        o = o + skip_ref[...].astype(jnp.float32)
    out_ref[...] = o.astype(out_ref.dtype)


def _fromrgb_kernel_skip(x_ref, mcol_ref, mrow_ref, w_ref, skip_ref, xout_ref, out_ref):
    _fromrgb_body(x_ref, mcol_ref, mrow_ref, w_ref, skip_ref, xout_ref, out_ref)


def _fromrgb_kernel_noskip(x_ref, mcol_ref, mrow_ref, w_ref, xout_ref, out_ref):
    _fromrgb_body(x_ref, mcol_ref, mrow_ref, w_ref, None, xout_ref, out_ref)


# ---------------------------------------------------------------------------
# Wrapper
# ---------------------------------------------------------------------------

def _vmem_capacity_bytes():
    try:
        return int(pltpu.get_tpu_info().vmem_capacity_bytes)
    except Exception:
        return 64 * 1024 * 1024   # conservative default (v7x per-TC VMEM)


def make_fromrgb(out_channel, H, W, dtype=jnp.float32, max_batch_tile=64):
    """Build a FromRGB forward:  (x, weight[, skip]) -> (x_wavelet, out)."""
    assert H % 2 == 0 and W % 2 == 0
    H2, W2 = H // 2, W // 2
    K = H2 * W2

    M_row, M_colT = _build_operators(H, W)
    MROW = jnp.asarray(M_row, jnp.float32)    # (4, 4, H2, H)
    MCOL = jnp.asarray(M_colT, jnp.float32)   # (4, 4, W,  W2)

    vmem_cap = _vmem_capacity_bytes()
    vmem_limit = int(min(0.75 * vmem_cap, 112 * 1024 * 1024))

    def _pick_bt(N, have_skip):
        # Rough f32 working-set per batch element (pipelined bufs + live values).
        per_elem = 4 * (3 * 4 * H * W            # x tile (2 bufs + live loads)
                        + 3 * 4 * K              # xout tile
                        + 3 * out_channel * K    # out tile + live accumulator
                        + (2 * out_channel * K if have_skip else 0)
                        + 8 * K + 4 * H * W2)    # misc intermediates
        const = 4 * (16 * H2 * H + 16 * W * W2 + out_channel * 4)
        budget = int(0.8 * vmem_limit)
        cap = max(1, (budget - const) // per_elem)
        cap = min(cap, max_batch_tile)
        if N >= 2:
            cap = min(cap, max(1, N // 2))       # >=2 grid steps: megacore + overlap
        bt = 1
        for d in range(1, N + 1):
            if N % d == 0 and d <= cap:
                bt = d
        return int(bt)

    def forward(x, weight, skip=None):
        # x: (N, 4, H, W); weight: (out_channel, 4, 1, 1); skip: (N, C, H2, W2) | None
        N = x.shape[0]
        bt = _pick_bt(N, skip is not None)

        # EqualConv2d(4, C, 1): scale 1/sqrt(4) folded into the weight here.
        w2 = (weight.reshape(out_channel, 4) * 0.5).astype(jnp.float32)

        const_buf = pl.Buffered(1)   # constant-index operands: no double buffer
        in_specs = [
            pl.BlockSpec((bt, 4, H, W), lambda b: (b, 0, 0, 0)),
            pl.BlockSpec((4, 4, W, W2), lambda b: (0, 0, 0, 0), pipeline_mode=const_buf),
            pl.BlockSpec((4, 4, H2, H), lambda b: (0, 0, 0, 0), pipeline_mode=const_buf),
            pl.BlockSpec((out_channel, 4), lambda b: (0, 0), pipeline_mode=const_buf),
        ]
        args = [x.astype(jnp.float32), MCOL, MROW, w2]
        if skip is not None:
            in_specs.append(pl.BlockSpec((bt, out_channel, K), lambda b: (b, 0, 0)))
            args.append(skip.reshape(N, out_channel, K).astype(jnp.float32))
            kernel = _fromrgb_kernel_skip
        else:
            kernel = _fromrgb_kernel_noskip   # no all-zeros skip streamed from HBM

        out_specs = (
            pl.BlockSpec((bt, 4, K), lambda b: (b, 0, 0)),
            pl.BlockSpec((bt, out_channel, K), lambda b: (b, 0, 0)),
        )
        out_shape = (
            jax.ShapeDtypeStruct((N, 4, K), dtype),
            jax.ShapeDtypeStruct((N, out_channel, K), dtype),
        )
        xo_flat, out_flat = pl.pallas_call(
            kernel,
            grid=(N // bt,),
            in_specs=in_specs,
            out_specs=out_specs,
            out_shape=out_shape,
            compiler_params=pltpu.CompilerParams(
                dimension_semantics=("parallel",),   # shard batch over v7x's 2 TCs
                vmem_limit_bytes=vmem_limit),
        )(*args)

        # pure metadata reshapes back to NCHW (no extra HBM pass)
        return (xo_flat.reshape(N, 4, H2, W2),
                out_flat.reshape(N, out_channel, H2, W2))

    return forward


# ---------------------------------------------------------------------------
# Pure-JAX reference (direct port of upfirdn2d_native + FromRGB)
# ---------------------------------------------------------------------------

def _upfirdn2d_ref(x, k, up=1, down=1, pad=(0, 0, 0, 0)):
    N, C, H, W = x.shape
    x = x.reshape(N, C, H, 1, W, 1)
    x = jnp.pad(x, ((0, 0), (0, 0), (0, 0), (0, up - 1), (0, 0), (0, up - 1)))
    x = x.reshape(N, C, H * up, W * up)
    px0, px1, py0, py1 = pad
    x = jnp.pad(x, ((0, 0), (0, 0), (py0, py1), (px0, px1)))
    kf = jnp.flip(jnp.asarray(k, x.dtype), (0, 1))
    y = jax.lax.conv_general_dilated(
        x.reshape(N * C, 1, x.shape[2], x.shape[3]), kf[None, None, :, :],
        window_strides=(down, down), padding="VALID",
        precision=jax.lax.Precision.HIGHEST)
    return y.reshape(N, C, y.shape[2], y.shape[3])


def _fromrgb_ref(x, weight2d, skip=None):
    s = 1.0 / np.sqrt(2.0)
    l = np.array([[s, s]])
    h = np.array([[-s, s]])
    ll, lh, hl, hh = l.T @ l, h.T @ l, l.T @ h, h.T @ h
    parts = jnp.split(x, 4, axis=1)
    y = None
    for p, k in zip(parts, [ll, -lh, -hl, hh]):          # InverseHaarTransform
        t = _upfirdn2d_ref(p, k, up=2, pad=(1, 0, 1, 0))
        y = t if y is None else y + t
    bk = np.outer([1.0, 3.0, 3.0, 1.0], [1.0, 3.0, 3.0, 1.0])
    bk = bk / bk.sum()
    y = _upfirdn2d_ref(y, bk, down=2, pad=(1, 1, 1, 1))  # Downsample(blur)
    xs = jnp.concatenate([_upfirdn2d_ref(y, k, down=2, pad=(0, 0, 0, 0))
                          for k in [ll, lh, hl, hh]], axis=1)  # HaarTransform
    out = jnp.einsum("oc,nchw->nohw", weight2d * 0.5, xs,
                     precision=jax.lax.Precision.HIGHEST)
    out = jnp.where(out >= 0, out, 0.2 * out)
    if skip is not None:
        out = out + skip
    return xs, out


# ---------------------------------------------------------------------------

if __name__ == "__main__":
    key = jax.random.PRNGKey(0)
    N, C_in, H, W = 2, 4, 16, 16
    out_channel = 8

    k1, k2, k3 = jax.random.split(key, 3)
    x = jax.random.normal(k1, (N, C_in, H, W), jnp.float32)
    weight = jax.random.normal(k2, (out_channel, 4, 1, 1), jnp.float32)
    skip = jax.random.normal(k3, (N, out_channel, H // 2, W // 2), jnp.float32)

    fwd = make_fromrgb(out_channel, H, W)
    x_new, out = fwd(x, weight, skip)          # with skip
    x_new2, out2 = fwd(x, weight)              # no-skip variant (separate kernel)
    jax.block_until_ready((x_new, out, x_new2, out2))

    assert x_new.shape == (N, 4, H // 2, W // 2)
    assert out.shape == (N, out_channel, H // 2, W // 2)
    assert x_new2.shape == x_new.shape and out2.shape == out.shape

    x_ref, out_ref = _fromrgb_ref(x, weight.reshape(out_channel, 4), skip)
    _, out_ref_ns = _fromrgb_ref(x, weight.reshape(out_channel, 4), None)

    def _err(a, b):
        d = float(jnp.max(jnp.abs(a - b)))
        r = float(jnp.linalg.norm(a - b) / (jnp.linalg.norm(b) + 1e-12))
        return d, r

    # all-f32 pipeline: tight tolerances (margin only for MXU f32 rounding)
    for got, ref in [(x_new, x_ref), (out, out_ref), (x_new2, x_ref), (out2, out_ref_ns)]:
        mx, rel = _err(got, ref)
        assert mx < 5e-2 and rel < 1e-2, f"mismatch vs reference: max={mx} rel={rel}"

    print("KERNEL_OK")
</pallas_src>

<mosaic_0001>
module attributes {stable_mosaic.version = 11 : i64} {
  func.func @_fromrgb_kernel_skip(%arg0: i32, %arg1: memref<1x4x16x16xf32, #tpu.memory_space<vmem>>, %arg2: memref<4x4x16x8xf32, #tpu.memory_space<vmem>>, %arg3: memref<4x4x8x16xf32, #tpu.memory_space<vmem>>, %arg4: memref<8x4xf32, #tpu.memory_space<vmem>>, %arg5: memref<1x8x64xf32, #tpu.memory_space<vmem>>, %arg6: memref<1x4x64xf32, #tpu.memory_space<vmem>>, %arg7: memref<1x8x64xf32, #tpu.memory_space<vmem>>) attributes {dimension_semantics = [#tpu.dimension_semantics<parallel>], iteration_bounds = array<i64: 2>, scalar_prefetch = 0 : i64, scratch_operands = 0 : i64, tpu.core_type = #tpu.core_type<tc>, window_params = [{transform_indices = @transform_0, window_bounds = array<i64: 1, 4, 16, 16>}, {pipeline_mode = #tpu.pipeline_mode<synchronous>, transform_indices = @transform_1, window_bounds = array<i64: 4, 4, 16, 8>}, {pipeline_mode = #tpu.pipeline_mode<synchronous>, transform_indices = @transform_2, window_bounds = array<i64: 4, 4, 8, 16>}, {pipeline_mode = #tpu.pipeline_mode<synchronous>, transform_indices = @transform_3, window_bounds = array<i64: 8, 4>}, {transform_indices = @transform_4, window_bounds = array<i64: 1, 8, 64>}, {transform_indices = @transform_5, window_bounds = array<i64: 1, 4, 64>}, {transform_indices = @transform_6, window_bounds = array<i64: 1, 8, 64>}]} {
    %c0 = arith.constant 0 : index
    %c0_0 = arith.constant 0 : index
    %c0_1 = arith.constant 0 : index
    %c0_2 = arith.constant 0 : index
    %0 = vector.load %arg1[%c0, %c0_0, %c0_1, %c0_2] : memref<1x4x16x16xf32, #tpu.memory_space<vmem>>, vector<1x1x16x16xf32>
    %1 = vector.shape_cast %0 : vector<1x1x16x16xf32> to vector<1x16x16xf32>
    %2 = vector.shape_cast %1 : vector<1x16x16xf32> to vector<16x16xf32>
    %c0_3 = arith.constant 0 : index
    %c1 = arith.constant 1 : index
    %c0_4 = arith.constant 0 : index
    %c0_5 = arith.constant 0 : index
    %3 = vector.load %arg1[%c0_3, %c1, %c0_4, %c0_5] : memref<1x4x16x16xf32, #tpu.memory_space<vmem>>, vector<1x1x16x16xf32>
    %4 = vector.shape_cast %3 : vector<1x1x16x16xf32> to vector<1x16x16xf32>
    %5 = vector.shape_cast %4 : vector<1x16x16xf32> to vector<16x16xf32>
    %c0_6 = arith.constant 0 : index
    %c2 = arith.constant 2 : index
    %c0_7 = arith.constant 0 : index
    %c0_8 = arith.constant 0 : index
    %6 = vector.load %arg1[%c0_6, %c2, %c0_7, %c0_8] : memref<1x4x16x16xf32, #tpu.memory_space<vmem>>, vector<1x1x16x16xf32>
    %7 = vector.shape_cast %6 : vector<1x1x16x16xf32> to vector<1x16x16xf32>
    %8 = vector.shape_cast %7 : vector<1x16x16xf32> to vector<16x16xf32>
    %c0_9 = arith.constant 0 : index
    %c3 = arith.constant 3 : index
    %c0_10 = arith.constant 0 : index
    %c0_11 = arith.constant 0 : index
    %9 = vector.load %arg1[%c0_9, %c3, %c0_10, %c0_11] : memref<1x4x16x16xf32, #tpu.memory_space<vmem>>, vector<1x1x16x16xf32>
    %10 = vector.shape_cast %9 : vector<1x1x16x16xf32> to vector<1x16x16xf32>
    %11 = vector.shape_cast %10 : vector<1x16x16xf32> to vector<16x16xf32>
    %cst = arith.constant 0.000000e+00 : f32
    %12 = vector.broadcast %cst : f32 to vector<1x8x8xf32>
    %c0_12 = arith.constant 0 : index
    %c0_13 = arith.constant 0 : index
    %c0_14 = arith.constant 0 : index
    %c0_15 = arith.constant 0 : index
    %13 = vector.load %arg2[%c0_12, %c0_13, %c0_14, %c0_15] : memref<4x4x16x8xf32, #tpu.memory_space<vmem>>, vector<1x1x16x8xf32>
    %14 = vector.shape_cast %13 : vector<1x1x16x8xf32> to vector<16x8xf32>
    %cst_16 = arith.constant dense<0.000000e+00> : vector<16x8xf32>
    %15 = tpu.matmul %2, %14, %cst_16 {dimension_numbers = #tpu.dot_dimension_numbers<[1], [0], [0], [1], [0, 0, 1, 1], [], []>} : vector<16x16xf32>, vector<16x8xf32>, vector<16x8xf32> -> vector<16x8xf32>
    %16 = vector.shape_cast %15 : vector<16x8xf32> to vector<1x16x8xf32>
    %c0_17 = arith.constant 0 : index
    %c0_18 = arith.constant 0 : index
    %c0_19 = arith.constant 0 : index
    %c0_20 = arith.constant 0 : index
    %17 = vector.load %arg3[%c0_17, %c0_18, %c0_19, %c0_20] : memref<4x4x8x16xf32, #tpu.memory_space<vmem>>, vector<1x1x8x16xf32>
    %18 = vector.shape_cast %17 : vector<1x1x8x16xf32> to vector<8x16xf32>
    %19 = vector.shape_cast %18 : vector<8x16xf32> to vector<1x8x16xf32>
    "tpu.trace_start"() <{level = 10 : i32, message = "bmh,bhn->bmn"}> : () -> ()
    %cst_21 = arith.constant dense<0.000000e+00> : vector<1x8x8xf32>
    %20 = tpu.matmul %19, %16, %cst_21 {dimension_numbers = #tpu.dot_dimension_numbers<[2], [1], [1], [2], [0, 0, 0, 1, 1, 2], [0], [0]>} : vector<1x8x16xf32>, vector<1x16x8xf32>, vector<1x8x8xf32> -> vector<1x8x8xf32>
    "tpu.trace_stop"() : () -> ()
    %21 = arith.addf %12, %20 : vector<1x8x8xf32>
    %c0_22 = arith.constant 0 : index
    %c1_23 = arith.constant 1 : index
    %c0_24 = arith.constant 0 : index
    %c0_25 = arith.constant 0 : index
    %22 = vector.load %arg2[%c0_22, %c1_23, %c0_24, %c0_25] : memref<4x4x16x8xf32, #tpu.memory_space<vmem>>, vector<1x1x16x8xf32>
    %23 = vector.shape_cast %22 : vector<1x1x16x8xf32> to vector<16x8xf32>
    %cst_26 = arith.constant dense<0.000000e+00> : vector<16x8xf32>
    %24 = tpu.matmul %5, %23, %cst_26 {dimension_numbers = #tpu.dot_dimension_numbers<[1], [0], [0], [1], [0, 0, 1, 1], [], []>} : vector<16x16xf32>, vector<16x8xf32>, vector<16x8xf32> -> vector<16x8xf32>
    %25 = vector.shape_cast %24 : vector<16x8xf32> to vector<1x16x8xf32>
    %c0_27 = arith.constant 0 : index
    %c1_28 = arith.constant 1 : index
    %c0_29 = arith.constant 0 : index
    %c0_30 = arith.constant 0 : index
    %26 = vector.load %arg3[%c0_27, %c1_28, %c0_29, %c0_30] : memref<4x4x8x16xf32, #tpu.memory_space<vmem>>, vector<1x1x8x16xf32>
    %27 = vector.shape_cast %26 : vector<1x1x8x16xf32> to vector<8x16xf32>
    %28 = vector.shape_cast %27 : vector<8x16xf32> to vector<1x8x16xf32>
    "tpu.trace_start"() <{level = 10 : i32, message = "bmh,bhn->bmn"}> : () -> ()
    %cst_31 = arith.constant dense<0.000000e+00> : vector<1x8x8xf32>
    %29 = tpu.matmul %28, %25, %cst_31 {dimension_numbers = #tpu.dot_dimension_numbers<[2], [1], [1], [2], [0, 0, 0, 1, 1, 2], [0], [0]>} : vector<1x8x16xf32>, vector<1x16x8xf32>, vector<1x8x8xf32> -> vector<1x8x8xf32>
    "tpu.trace_stop"() : () -> ()
    %30 = arith.addf %21, %29 : vector<1x8x8xf32>
    %c0_32 = arith.constant 0 : index
    %c2_33 = arith.constant 2 : index
    %c0_34 = arith.constant 0 : index
    %c0_35 = arith.constant 0 : index
    %31 = vector.load %arg2[%c0_32, %c2_33, %c0_34, %c0_35] : memref<4x4x16x8xf32, #tpu.memory_space<vmem>>, vector<1x1x16x8xf32>
    %32 = vector.shape_cast %31 : vector<1x1x16x8xf32> to vector<16x8xf32>
    %cst_36 = arith.constant dense<0.000000e+00> : vector<16x8xf32>
    %33 = tpu.matmul %8, %32, %cst_36 {dimension_numbers = #tpu.dot_dimension_numbers<[1], [0], [0], [1], [0, 0, 1, 1], [], []>} : vector<16x16xf32>, vector<16x8xf32>, vector<16x8xf32> -> vector<16x8xf32>
    %34 = vector.shape_cast %33 : vector<16x8xf32> to vector<1x16x8xf32>
    %c0_37 = arith.constant 0 : index
    %c2_38 = arith.constant 2 : index
    %c0_39 = arith.constant 0 : index
    %c0_40 = arith.constant 0 : index
    %35 = vector.load %arg3[%c0_37, %c2_38, %c0_39, %c0_40] : memref<4x4x8x16xf32, #tpu.memory_space<vmem>>, vector<1x1x8x16xf32>
    %36 = vector.shape_cast %35 : vector<1x1x8x16xf32> to vector<8x16xf32>
    %37 = vector.shape_cast %36 : vector<8x16xf32> to vector<1x8x16xf32>
    "tpu.trace_start"() <{level = 10 : i32, message = "bmh,bhn->bmn"}> : () -> ()
    %cst_41 = arith.constant dense<0.000000e+00> : vector<1x8x8xf32>
    %38 = tpu.matmul %37, %34, %cst_41 {dimension_numbers = #tpu.dot_dimension_numbers<[2], [1], [1], [2], [0, 0, 0, 1, 1, 2], [0], [0]>} : vector<1x8x16xf32>, vector<1x16x8xf32>, vector<1x8x8xf32> -> vector<1x8x8xf32>
    "tpu.trace_stop"() : () -> ()
    %39 = arith.addf %30, %38 : vector<1x8x8xf32>
    %c0_42 = arith.constant 0 : index
    %c3_43 = arith.constant 3 : index
    %c0_44 = arith.constant 0 : index
    %c0_45 = arith.constant 0 : index
    %40 = vector.load %arg2[%c0_42, %c3_43, %c0_44, %c0_45] : memref<4x4x16x8xf32, #tpu.memory_space<vmem>>, vector<1x1x16x8xf32>
    %41 = vector.shape_cast %40 : vector<1x1x16x8xf32> to vector<16x8xf32>
    %cst_46 = arith.constant dense<0.000000e+00> : vector<16x8xf32>
    %42 = tpu.matmul %11, %41, %cst_46 {dimension_numbers = #tpu.dot_dimension_numbers<[1], [0], [0], [1], [0, 0, 1, 1], [], []>} : vector<16x16xf32>, vector<16x8xf32>, vector<16x8xf32> -> vector<16x8xf32>
    %43 = vector.shape_cast %42 : vector<16x8xf32> to vector<1x16x8xf32>
    %c0_47 = arith.constant 0 : index
    %c3_48 = arith.constant 3 : index
    %c0_49 = arith.constant 0 : index
    %c0_50 = arith.constant 0 : index
    %44 = vector.load %arg3[%c0_47, %c3_48, %c0_49, %c0_50] : memref<4x4x8x16xf32, #tpu.memory_space<vmem>>, vector<1x1x8x16xf32>
    %45 = vector.shape_cast %44 : vector<1x1x8x16xf32> to vector<8x16xf32>
    %46 = vector.shape_cast %45 : vector<8x16xf32> to vector<1x8x16xf32>
    "tpu.trace_start"() <{level = 10 : i32, message = "bmh,bhn->bmn"}> : () -> ()
    %cst_51 = arith.constant dense<0.000000e+00> : vector<1x8x8xf32>
    %47 = tpu.matmul %46, %43, %cst_51 {dimension_numbers = #tpu.dot_dimension_numbers<[2], [1], [1], [2], [0, 0, 0, 1, 1, 2], [0], [0]>} : vector<1x8x16xf32>, vector<1x16x8xf32>, vector<1x8x8xf32> -> vector<1x8x8xf32>
    "tpu.trace_stop"() : () -> ()
    %48 = arith.addf %39, %47 : vector<1x8x8xf32>
    %49 = vector.shape_cast %48 : vector<1x8x8xf32> to vector<1x64xf32>
    %cst_52 = arith.constant 0.000000e+00 : f32
    %50 = vector.broadcast %cst_52 : f32 to vector<1x8x8xf32>
    %c1_53 = arith.constant 1 : index
    %c0_54 = arith.constant 0 : index
    %c0_55 = arith.constant 0 : index
    %c0_56 = arith.constant 0 : index
    %51 = vector.load %arg2[%c1_53, %c0_54, %c0_55, %c0_56] : memref<4x4x16x8xf32, #tpu.memory_space<vmem>>, vector<1x1x16x8xf32>
    %52 = vector.shape_cast %51 : vector<1x1x16x8xf32> to vector<16x8xf32>
    %cst_57 = arith.constant dense<0.000000e+00> : vector<16x8xf32>
    %53 = tpu.matmul %2, %52, %cst_57 {dimension_numbers = #tpu.dot_dimension_numbers<[1], [0], [0], [1], [0, 0, 1, 1], [], []>} : vector<16x16xf32>, vector<16x8xf32>, vector<16x8xf32> -> vector<16x8xf32>
    %54 = vector.shape_cast %53 : vector<16x8xf32> to vector<1x16x8xf32>
    %c1_58 = arith.constant 1 : index
    %c0_59 = arith.constant 0 : index
    %c0_60 = arith.constant 0 : index
    %c0_61 = arith.constant 0 : index
    %55 = vector.load %arg3[%c1_58, %c0_59, %c0_60, %c0_61] : memref<4x4x8x16xf32, #tpu.memory_space<vmem>>, vector<1x1x8x16xf32>
    %56 = vector.shape_cast %55 : vector<1x1x8x16xf32> to vector<8x16xf32>
    %57 = vector.shape_cast %56 : vector<8x16xf32> to vector<1x8x16xf32>
    "tpu.trace_start"() <{level = 10 : i32, message = "bmh,bhn->bmn"}> : () -> ()
    %cst_62 = arith.constant dense<0.000000e+00> : vector<1x8x8xf32>
    %58 = tpu.matmul %57, %54, %cst_62 {dimension_numbers = #tpu.dot_dimension_numbers<[2], [1], [1], [2], [0, 0, 0, 1, 1, 2], [0], [0]>} : vector<1x8x16xf32>, vector<1x16x8xf32>, vector<1x8x8xf32> -> vector<1x8x8xf32>
    "tpu.trace_stop"() : () -> ()
    %59 = arith.addf %50, %58 : vector<1x8x8xf32>
    %c1_63 = arith.constant 1 : index
    %c1_64 = arith.constant 1 : index
    %c0_65 = arith.constant 0 : index
    %c0_66 = arith.constant 0 : index
    %60 = vector.load %arg2[%c1_63, %c1_64, %c0_65, %c0_66] : memref<4x4x16x8xf32, #tpu.memory_space<vmem>>, vector<1x1x16x8xf32>
    %61 = vector.shape_cast %60 : vector<1x1x16x8xf32> to vector<16x8xf32>
    %cst_67 = arith.constant dense<0.000000e+00> : vector<16x8xf32>
    %62 = tpu.matmul %5, %61, %cst_67 {dimension_numbers = #tpu.dot_dimension_numbers<[1], [0], [0], [1], [0, 0, 1, 1], [], []>} : vector<16x16xf32>, vector<16x8xf32>, vector<16x8xf32> -> vector<16x8xf32>
    %63 = vector.shape_cast %62 : vector<16x8xf32> to vector<1x16x8xf32>
    %c1_68 = arith.constant 1 : index
    %c1_69 = arith.constant 1 : index
    %c0_70 = arith.constant 0 : index
    %c0_71 = arith.constant 0 : index
    %64 = vector.load %arg3[%c1_68, %c1_69, %c0_70, %c0_71] : memref<4x4x8x16xf32, #tpu.memory_space<vmem>>, vector<1x1x8x16xf32>
    %65 = vector.shape_cast %64 : vector<1x1x8x16xf32> to vector<8x16xf32>
    %66 = vector.shape_cast %65 : vector<8x16xf32> to vector<1x8x16xf32>
    "tpu.trace_start"() <{level = 10 : i32, message = "bmh,bhn->bmn"}> : () -> ()
    %cst_72 = arith.constant dense<0.000000e+00> : vector<1x8x8xf32>
    %67 = tpu.matmul %66, %63, %cst_72 {dimension_numbers = #tpu.dot_dimension_numbers<[2], [1], [1], [2], [0, 0, 0, 1, 1, 2], [0], [0]>} : vector<1x8x16xf32>, vector<1x16x8xf32>, vector<1x8x8xf32> -> vector<1x8x8xf32>
    "tpu.trace_stop"() : () -> ()
    %68 = arith.addf %59, %67 : vector<1x8x8xf32>
    %c1_73 = arith.constant 1 : index
    %c2_74 = arith.constant 2 : index
    %c0_75 = arith.constant 0 : index
    %c0_76 = arith.constant 0 : index
    %69 = vector.load %arg2[%c1_73, %c2_74, %c0_75, %c0_76] : memref<4x4x16x8xf32, #tpu.memory_space<vmem>>, vector<1x1x16x8xf32>
    %70 = vector.shape_cast %69 : vector<1x1x16x8xf32> to vector<16x8xf32>
    %cst_77 = arith.constant dense<0.000000e+00> : vector<16x8xf32>
    %71 = tpu.matmul %8, %70, %cst_77 {dimension_numbers = #tpu.dot_dimension_numbers<[1], [0], [0], [1], [0, 0, 1, 1], [], []>} : vector<16x16xf32>, vector<16x8xf32>, vector<16x8xf32> -> vector<16x8xf32>
    %72 = vector.shape_cast %71 : vector<16x8xf32> to vector<1x16x8xf32>
    %c1_78 = arith.constant 1 : index
    %c2_79 = arith.constant 2 : index
    %c0_80 = arith.constant 0 : index
    %c0_81 = arith.constant 0 : index
    %73 = vector.load %arg3[%c1_78, %c2_79, %c0_80, %c0_81] : memref<4x4x8x16xf32, #tpu.memory_space<vmem>>, vector<1x1x8x16xf32>
    %74 = vector.shape_cast %73 : vector<1x1x8x16xf32> to vector<8x16xf32>
    %75 = vector.shape_cast %74 : vector<8x16xf32> to vector<1x8x16xf32>
    "tpu.trace_start"() <{level = 10 : i32, message = "bmh,bhn->bmn"}> : () -> ()
    %cst_82 = arith.constant dense<0.000000e+00> : vector<1x8x8xf32>
    %76 = tpu.matmul %75, %72, %cst_82 {dimension_numbers = #tpu.dot_dimension_numbers<[2], [1], [1], [2], [0, 0, 0, 1, 1, 2], [0], [0]>} : vector<1x8x16xf32>, vector<1x16x8xf32>, vector<1x8x8xf32> -> vector<1x8x8xf32>
    "tpu.trace_stop"() : () -> ()
    %77 = arith.addf %68, %76 : vector<1x8x8xf32>
    %c1_83 = arith.constant 1 : index
    %c3_84 = arith.constant 3 : index
    %c0_85 = arith.constant 0 : index
    %c0_86 = arith.constant 0 : index
    %78 = vector.load %arg2[%c1_83, %c3_84, %c0_85, %c0_86] : memref<4x4x16x8xf32, #tpu.memory_space<vmem>>, vector<1x1x16x8xf32>
    %79 = vector.shape_cast %78 : vector<1x1x16x8xf32> to vector<16x8xf32>
    %cst_87 = arith.constant dense<0.000000e+00> : vector<16x8xf32>
    %80 = tpu.matmul %11, %79, %cst_87 {dimension_numbers = #tpu.dot_dimension_numbers<[1], [0], [0], [1], [0, 0, 1, 1], [], []>} : vector<16x16xf32>, vector<16x8xf32>, vector<16x8xf32> -> vector<16x8xf32>
    %81 = vector.shape_cast %80 : vector<16x8xf32> to vector<1x16x8xf32>
    %c1_88 = arith.constant 1 : index
    %c3_89 = arith.constant 3 : index
    %c0_90 = arith.constant 0 : index
    %c0_91 = arith.constant 0 : index
    %82 = vector.load %arg3[%c1_88, %c3_89, %c0_90, %c0_91] : memref<4x4x8x16xf32, #tpu.memory_space<vmem>>, vector<1x1x8x16xf32>
    %83 = vector.shape_cast %82 : vector<1x1x8x16xf32> to vector<8x16xf32>
    %84 = vector.shape_cast %83 : vector<8x16xf32> to vector<1x8x16xf32>
    "tpu.trace_start"() <{level = 10 : i32, message = "bmh,bhn->bmn"}> : () -> ()
    %cst_92 = arith.constant dense<0.000000e+00> : vector<1x8x8xf32>
    %85 = tpu.matmul %84, %81, %cst_92 {dimension_numbers = #tpu.dot_dimension_numbers<[2], [1], [1], [2], [0, 0, 0, 1, 1, 2], [0], [0]>} : vector<1x8x16xf32>, vector<1x16x8xf32>, vector<1x8x8xf32> -> vector<1x8x8xf32>
    "tpu.trace_stop"() : () -> ()
    %86 = arith.addf %77, %85 : vector<1x8x8xf32>
    %87 = vector.shape_cast %86 : vector<1x8x8xf32> to vector<1x64xf32>
    %cst_93 = arith.constant 0.000000e+00 : f32
    %88 = vector.broadcast %cst_93 : f32 to vector<1x8x8xf32>
    %c2_94 = arith.constant 2 : index
    %c0_95 = arith.constant 0 : index
    %c0_96 = arith.constant 0 : index
    %c0_97 = arith.constant 0 : index
    %89 = vector.load %arg2[%c2_94, %c0_95, %c0_96, %c0_97] : memref<4x4x16x8xf32, #tpu.memory_space<vmem>>, vector<1x1x16x8xf32>
    %90 = vector.shape_cast %89 : vector<1x1x16x8xf32> to vector<16x8xf32>
    %cst_98 = arith.constant dense<0.000000e+00> : vector<16x8xf32>
    %91 = tpu.matmul %2, %90, %cst_98 {dimension_numbers = #tpu.dot_dimension_numbers<[1], [0], [0], [1], [0, 0, 1, 1], [], []>} : vector<16x16xf32>, vector<16x8xf32>, vector<16x8xf32> -> vector<16x8xf32>
    %92 = vector.shape_cast %91 : vector<16x8xf32> to vector<1x16x8xf32>
    %c2_99 = arith.constant 2 : index
    %c0_100 = arith.constant 0 : index
    %c0_101 = arith.constant 0 : index
    %c0_102 = arith.constant 0 : index
    %93 = vector.load %arg3[%c2_99, %c0_100, %c0_101, %c0_102] : memref<4x4x8x16xf32, #tpu.memory_space<vmem>>, vector<1x1x8x16xf32>
    %94 = vector.shape_cast %93 : vector<1x1x8x16xf32> to vector<8x16xf32>
    %95 = vector.shape_cast %94 : vector<8x16xf32> to vector<1x8x16xf32>
    "tpu.trace_start"() <{level = 10 : i32, message = "bmh,bhn->bmn"}> : () -> ()
    %cst_103 = arith.constant dense<0.000000e+00> : vector<1x8x8xf32>
    %96 = tpu.matmul %95, %92, %cst_103 {dimension_numbers = #tpu.dot_dimension_numbers<[2], [1], [1], [2], [0, 0, 0, 1, 1, 2], [0], [0]>} : vector<1x8x16xf32>, vector<1x16x8xf32>, vector<1x8x8xf32> -> vector<1x8x8xf32>
    "tpu.trace_stop"() : () -> ()
    %97 = arith.addf %88, %96 : vector<1x8x8xf32>
    %c2_104 = arith.constant 2 : index
    %c1_105 = arith.constant 1 : index
    %c0_106 = arith.constant 0 : index
    %c0_107 = arith.constant 0 : index
    %98 = vector.load %arg2[%c2_104, %c1_105, %c0_106, %c0_107] : memref<4x4x16x8xf32, #tpu.memory_space<vmem>>, vector<1x1x16x8xf32>
    %99 = vector.shape_cast %98 : vector<1x1x16x8xf32> to vector<16x8xf32>
    %cst_108 = arith.constant dense<0.000000e+00> : vector<16x8xf32>
    %100 = tpu.matmul %5, %99, %cst_108 {dimension_numbers = #tpu.dot_dimension_numbers<[1], [0], [0], [1], [0, 0, 1, 1], [], []>} : vector<16x16xf32>, vector<16x8xf32>, vector<16x8xf32> -> vector<16x8xf32>
    %101 = vector.shape_cast %100 : vector<16x8xf32> to vector<1x16x8xf32>
    %c2_109 = arith.constant 2 : index
    %c1_110 = arith.constant 1 : index
    %c0_111 = arith.constant 0 : index
    %c0_112 = arith.constant 0 : index
    %102 = vector.load %arg3[%c2_109, %c1_110, %c0_111, %c0_112] : memref<4x4x8x16xf32, #tpu.memory_space<vmem>>, vector<1x1x8x16xf32>
    %103 = vector.shape_cast %102 : vector<1x1x8x16xf32> to vector<8x16xf32>
    %104 = vector.shape_cast %103 : vector<8x16xf32> to vector<1x8x16xf32>
    "tpu.trace_start"() <{level = 10 : i32, message = "bmh,bhn->bmn"}> : () -> ()
    %cst_113 = arith.constant dense<0.000000e+00> : vector<1x8x8xf32>
    %105 = tpu.matmul %104, %101, %cst_113 {dimension_numbers = #tpu.dot_dimension_numbers<[2], [1], [1], [2], [0, 0, 0, 1, 1, 2], [0], [0]>} : vector<1x8x16xf32>, vector<1x16x8xf32>, vector<1x8x8xf32> -> vector<1x8x8xf32>
    "tpu.trace_stop"() : () -> ()
    %106 = arith.addf %97, %105 : vector<1x8x8xf32>
    %c2_114 = arith.constant 2 : index
    %c2_115 = arith.constant 2 : index
    %c0_116 = arith.constant 0 : index
    %c0_117 = arith.constant 0 : index
    %107 = vector.load %arg2[%c2_114, %c2_115, %c0_116, %c0_117] : memref<4x4x16x8xf32, #tpu.memory_space<vmem>>, vector<1x1x16x8xf32>
    %108 = vector.shape_cast %107 : vector<1x1x16x8xf32> to vector<16x8xf32>
    %cst_118 = arith.constant dense<0.000000e+00> : vector<16x8xf32>
    %109 = tpu.matmul %8, %108, %cst_118 {dimension_numbers = #tpu.dot_dimension_numbers<[1], [0], [0], [1], [0, 0, 1, 1], [], []>} : vector<16x16xf32>, vector<16x8xf32>, vector<16x8xf32> -> vector<16x8xf32>
    %110 = vector.shape_cast %109 : vector<16x8xf32> to vector<1x16x8xf32>
    %c2_119 = arith.constant 2 : index
    %c2_120 = arith.constant 2 : index
    %c0_121 = arith.constant 0 : index
    %c0_122 = arith.constant 0 : index
    %111 = vector.load %arg3[%c2_119, %c2_120, %c0_121, %c0_122] : memref<4x4x8x16xf32, #tpu.memory_space<vmem>>, vector<1x1x8x16xf32>
    %112 = vector.shape_cast %111 : vector<1x1x8x16xf32> to vector<8x16xf32>
    %113 = vector.shape_cast %112 : vector<8x16xf32> to vector<1x8x16xf32>
    "tpu.trace_start"() <{level = 10 : i32, message = "bmh,bhn->bmn"}> : () -> ()
    %cst_123 = arith.constant dense<0.000000e+00> : vector<1x8x8xf32>
    %114 = tpu.matmul %113, %110, %cst_123 {dimension_numbers = #tpu.dot_dimension_numbers<[2], [1], [1], [2], [0, 0, 0, 1, 1, 2], [0], [0]>} : vector<1x8x16xf32>, vector<1x16x8xf32>, vector<1x8x8xf32> -> vector<1x8x8xf32>
    "tpu.trace_stop"() : () -> ()
    %115 = arith.addf %106, %114 : vector<1x8x8xf32>
    %c2_124 = arith.constant 2 : index
    %c3_125 = arith.constant 3 : index
    %c0_126 = arith.constant 0 : index
    %c0_127 = arith.constant 0 : index
    %116 = vector.load %arg2[%c2_124, %c3_125, %c0_126, %c0_127] : memref<4x4x16x8xf32, #tpu.memory_space<vmem>>, vector<1x1x16x8xf32>
    %117 = vector.shape_cast %116 : vector<1x1x16x8xf32> to vector<16x8xf32>
    %cst_128 = arith.constant dense<0.000000e+00> : vector<16x8xf32>
    %118 = tpu.matmul %11, %117, %cst_128 {dimension_numbers = #tpu.dot_dimension_numbers<[1], [0], [0], [1], [0, 0, 1, 1], [], []>} : vector<16x16xf32>, vector<16x8xf32>, vector<16x8xf32> -> vector<16x8xf32>
    %119 = vector.shape_cast %118 : vector<16x8xf32> to vector<1x16x8xf32>
    %c2_129 = arith.constant 2 : index
    %c3_130 = arith.constant 3 : index
    %c0_131 = arith.constant 0 : index
    %c0_132 = arith.constant 0 : index
    %120 = vector.load %arg3[%c2_129, %c3_130, %c0_131, %c0_132] : memref<4x4x8x16xf32, #tpu.memory_space<vmem>>, vector<1x1x8x16xf32>
    %121 = vector.shape_cast %120 : vector<1x1x8x16xf32> to vector<8x16xf32>
    %122 = vector.shape_cast %121 : vector<8x16xf32> to vector<1x8x16xf32>
    "tpu.trace_start"() <{level = 10 : i32, message = "bmh,bhn->bmn"}> : () -> ()
    %cst_133 = arith.constant dense<0.000000e+00> : vector<1x8x8xf32>
    %123 = tpu.matmul %122, %119, %cst_133 {dimension_numbers = #tpu.dot_dimension_numbers<[2], [1], [1], [2], [0, 0, 0, 1, 1, 2], [0], [0]>} : vector<1x8x16xf32>, vector<1x16x8xf32>, vector<1x8x8xf32> -> vector<1x8x8xf32>
    "tpu.trace_stop"() : () -> ()
    %124 = arith.addf %115, %123 : vector<1x8x8xf32>
    %125 = vector.shape_cast %124 : vector<1x8x8xf32> to vector<1x64xf32>
    %cst_134 = arith.constant 0.000000e+00 : f32
    %126 = vector.broadcast %cst_134 : f32 to vector<1x8x8xf32>
    %c3_135 = arith.constant 3 : index
    %c0_136 = arith.constant 0 : index
    %c0_137 = arith.constant 0 : index
    %c0_138 = arith.constant 0 : index
    %127 = vector.load %arg2[%c3_135, %c0_136, %c0_137, %c0_138] : memref<4x4x16x8xf32, #tpu.memory_space<vmem>>, vector<1x1x16x8xf32>
    %128 = vector.shape_cast %127 : vector<1x1x16x8xf32> to vector<16x8xf32>
    %cst_139 = arith.constant dense<0.000000e+00> : vector<16x8xf32>
    %129 = tpu.matmul %2, %128, %cst_139 {dimension_numbers = #tpu.dot_dimension_numbers<[1], [0], [0], [1], [0, 0, 1, 1], [], []>} : vector<16x16xf32>, vector<16x8xf32>, vector<16x8xf32> -> vector<16x8xf32>
    %130 = vector.shape_cast %129 : vector<16x8xf32> to vector<1x16x8xf32>
    %c3_140 = arith.constant 3 : index
    %c0_141 = arith.constant 0 : index
    %c0_142 = arith.constant 0 : index
    %c0_143 = arith.constant 0 : index
    %131 = vector.load %arg3[%c3_140, %c0_141, %c0_142, %c0_143] : memref<4x4x8x16xf32, #tpu.memory_space<vmem>>, vector<1x1x8x16xf32>
    %132 = vector.shape_cast %131 : vector<1x1x8x16xf32> to vector<8x16xf32>
    %133 = vector.shape_cast %132 : vector<8x16xf32> to vector<1x8x16xf32>
    "tpu.trace_start"() <{level = 10 : i32, message = "bmh,bhn->bmn"}> : () -> ()
    %cst_144 = arith.constant dense<0.000000e+00> : vector<1x8x8xf32>
    %134 = tpu.matmul %133, %130, %cst_144 {dimension_numbers = #tpu.dot_dimension_numbers<[2], [1], [1], [2], [0, 0, 0, 1, 1, 2], [0], [0]>} : vector<1x8x16xf32>, vector<1x16x8xf32>, vector<1x8x8xf32> -> vector<1x8x8xf32>
    "tpu.trace_stop"() : () -> ()
    %135 = arith.addf %126, %134 : vector<1x8x8xf32>
    %c3_145 = arith.constant 3 : index
    %c1_146 = arith.constant 1 : index
    %c0_147 = arith.constant 0 : index
    %c0_148 = arith.constant 0 : index
    %136 = vector.load %arg2[%c3_145, %c1_146, %c0_147, %c0_148] : memref<4x4x16x8xf32, #tpu.memory_space<vmem>>, vector<1x1x16x8xf32>
    %137 = vector.shape_cast %136 : vector<1x1x16x8xf32> to vector<16x8xf32>
    %cst_149 = arith.constant dense<0.000000e+00> : vector<16x8xf32>
    %138 = tpu.matmul %5, %137, %cst_149 {dimension_numbers = #tpu.dot_dimension_numbers<[1], [0], [0], [1], [0, 0, 1, 1], [], []>} : vector<16x16xf32>, vector<16x8xf32>, vector<16x8xf32> -> vector<16x8xf32>
    %139 = vector.shape_cast %138 : vector<16x8xf32> to vector<1x16x8xf32>
    %c3_150 = arith.constant 3 : index
    %c1_151 = arith.constant 1 : index
    %c0_152 = arith.constant 0 : index
    %c0_153 = arith.constant 0 : index
    %140 = vector.load %arg3[%c3_150, %c1_151, %c0_152, %c0_153] : memref<4x4x8x16xf32, #tpu.memory_space<vmem>>, vector<1x1x8x16xf32>
    %141 = vector.shape_cast %140 : vector<1x1x8x16xf32> to vector<8x16xf32>
    %142 = vector.shape_cast %141 : vector<8x16xf32> to vector<1x8x16xf32>
    "tpu.trace_start"() <{level = 10 : i32, message = "bmh,bhn->bmn"}> : () -> ()
    %cst_154 = arith.constant dense<0.000000e+00> : vector<1x8x8xf32>
    %143 = tpu.matmul %142, %139, %cst_154 {dimension_numbers = #tpu.dot_dimension_numbers<[2], [1], [1], [2], [0, 0, 0, 1, 1, 2], [0], [0]>} : vector<1x8x16xf32>, vector<1x16x8xf32>, vector<1x8x8xf32> -> vector<1x8x8xf32>
    "tpu.trace_stop"() : () -> ()
    %144 = arith.addf %135, %143 : vector<1x8x8xf32>
    %c3_155 = arith.constant 3 : index
    %c2_156 = arith.constant 2 : index
    %c0_157 = arith.constant 0 : index
    %c0_158 = arith.constant 0 : index
    %145 = vector.load %arg2[%c3_155, %c2_156, %c0_157, %c0_158] : memref<4x4x16x8xf32, #tpu.memory_space<vmem>>, vector<1x1x16x8xf32>
    %146 = vector.shape_cast %145 : vector<1x1x16x8xf32> to vector<16x8xf32>
    %cst_159 = arith.constant dense<0.000000e+00> : vector<16x8xf32>
    %147 = tpu.matmul %8, %146, %cst_159 {dimension_numbers = #tpu.dot_dimension_numbers<[1], [0], [0], [1], [0, 0, 1, 1], [], []>} : vector<16x16xf32>, vector<16x8xf32>, vector<16x8xf32> -> vector<16x8xf32>
    %148 = vector.shape_cast %147 : vector<16x8xf32> to vector<1x16x8xf32>
    %c3_160 = arith.constant 3 : index
    %c2_161 = arith.constant 2 : index
    %c0_162 = arith.constant 0 : index
    %c0_163 = arith.constant 0 : index
    %149 = vector.load %arg3[%c3_160, %c2_161, %c0_162, %c0_163] : memref<4x4x8x16xf32, #tpu.memory_space<vmem>>, vector<1x1x8x16xf32>
    %150 = vector.shape_cast %149 : vector<1x1x8x16xf32> to vector<8x16xf32>
    %151 = vector.shape_cast %150 : vector<8x16xf32> to vector<1x8x16xf32>
    "tpu.trace_start"() <{level = 10 : i32, message = "bmh,bhn->bmn"}> : () -> ()
    %cst_164 = arith.constant dense<0.000000e+00> : vector<1x8x8xf32>
    %152 = tpu.matmul %151, %148, %cst_164 {dimension_numbers = #tpu.dot_dimension_numbers<[2], [1], [1], [2], [0, 0, 0, 1, 1, 2], [0], [0]>} : vector<1x8x16xf32>, vector<1x16x8xf32>, vector<1x8x8xf32> -> vector<1x8x8xf32>
    "tpu.trace_stop"() : () -> ()
    %153 = arith.addf %144, %152 : vector<1x8x8xf32>
    %c3_165 = arith.constant 3 : index
    %c3_166 = arith.constant 3 : index
    %c0_167 = arith.constant 0 : index
    %c0_168 = arith.constant 0 : index
    %154 = vector.load %arg2[%c3_165, %c3_166, %c0_167, %c0_168] : memref<4x4x16x8xf32, #tpu.memory_space<vmem>>, vector<1x1x16x8xf32>
    %155 = vector.shape_cast %154 : vector<1x1x16x8xf32> to vector<16x8xf32>
    %cst_169 = arith.constant dense<0.000000e+00> : vector<16x8xf32>
    %156 = tpu.matmul %11, %155, %cst_169 {dimension_numbers = #tpu.dot_dimension_numbers<[1], [0], [0], [1], [0, 0, 1, 1], [], []>} : vector<16x16xf32>, vector<16x8xf32>, vector<16x8xf32> -> vector<16x8xf32>
    %157 = vector.shape_cast %156 : vector<16x8xf32> to vector<1x16x8xf32>
    %c3_170 = arith.constant 3 : index
    %c3_171 = arith.constant 3 : index
    %c0_172 = arith.constant 0 : index
    %c0_173 = arith.constant 0 : index
    %158 = vector.load %arg3[%c3_170, %c3_171, %c0_172, %c0_173] : memref<4x4x8x16xf32, #tpu.memory_space<vmem>>, vector<1x1x8x16xf32>
    %159 = vector.shape_cast %158 : vector<1x1x8x16xf32> to vector<8x16xf32>
    %160 = vector.shape_cast %159 : vector<8x16xf32> to vector<1x8x16xf32>
    "tpu.trace_start"() <{level = 10 : i32, message = "bmh,bhn->bmn"}> : () -> ()
    %cst_174 = arith.constant dense<0.000000e+00> : vector<1x8x8xf32>
    %161 = tpu.matmul %160, %157, %cst_174 {dimension_numbers = #tpu.dot_dimension_numbers<[2], [1], [1], [2], [0, 0, 0, 1, 1, 2], [0], [0]>} : vector<1x8x16xf32>, vector<1x16x8xf32>, vector<1x8x8xf32> -> vector<1x8x8xf32>
    "tpu.trace_stop"() : () -> ()
    %162 = arith.addf %153, %161 : vector<1x8x8xf32>
    %163 = vector.shape_cast %162 : vector<1x8x8xf32> to vector<1x64xf32>
    %164 = vector.shape_cast %49 : vector<1x64xf32> to vector<1x1x64xf32>
    %165 = vector.shape_cast %87 : vector<1x64xf32> to vector<1x1x64xf32>
    %166 = vector.shape_cast %125 : vector<1x64xf32> to vector<1x1x64xf32>
    %167 = vector.shape_cast %163 : vector<1x64xf32> to vector<1x1x64xf32>
    %168 = tpu.concatenate %164, %165, %166, %167 in 1 : vector<1x1x64xf32>, vector<1x1x64xf32>, vector<1x1x64xf32>, vector<1x1x64xf32> -> vector<1x4x64xf32>
    %c0_175 = arith.constant 0 : index
    %c0_176 = arith.constant 0 : index
    %c0_177 = arith.constant 0 : index
    %169 = vector.load %arg6[%c0_175, %c0_176, %c0_177] : memref<1x4x64xf32, #tpu.memory_space<vmem>>, vector<1x4x64xf32>
    tpu.vector_store %arg6[%c0_175, %c0_176, %c0_177], %168 {strides = array<i32>} : memref<1x4x64xf32, #tpu.memory_space<vmem>>, vector<1x4x64xf32>,
    %c0_178 = arith.constant 0 : index
    %c0_179 = arith.constant 0 : index
    %170 = vector.load %arg4[%c0_178, %c0_179] : memref<8x4xf32, #tpu.memory_space<vmem>>, vector<8x4xf32>
    %171 = vector.shape_cast %170 : vector<8x4xf32> to vector<1x8x4xf32>
    "tpu.trace_start"() <{level = 10 : i32, message = "bct,btk->bck"}> : () -> ()
    %cst_180 = arith.constant dense<0.000000e+00> : vector<1x8x64xf32>
    %172 = tpu.matmul %171, %168, %cst_180 {dimension_numbers = #tpu.dot_dimension_numbers<[2], [1], [1], [2], [0, 0, 0, 1, 1, 2], [0], [0]>} : vector<1x8x4xf32>, vector<1x4x64xf32>, vector<1x8x64xf32> -> vector<1x8x64xf32>
    %cst_181 = arith.constant 0.000000e+00 : f32
    "tpu.trace_stop"() : () -> ()
    %173 = vector.broadcast %cst_181 : f32 to vector<1x8x64xf32>
    %174 = arith.cmpf oge, %172, %173 : vector<1x8x64xf32>
    %cst_182 = arith.constant 2.000000e-01 : f32
    %175 = vector.broadcast %cst_182 : f32 to vector<1x8x64xf32>
    %176 = arith.mulf %175, %172 : vector<1x8x64xf32>
    %177 = arith.select %174, %172, %176 : vector<1x8x64xi1>, vector<1x8x64xf32>
    %c0_183 = arith.constant 0 : index
    %c0_184 = arith.constant 0 : index
    %c0_185 = arith.constant 0 : index
    %178 = vector.load %arg5[%c0_183, %c0_184, %c0_185] : memref<1x8x64xf32, #tpu.memory_space<vmem>>, vector<1x8x64xf32>
    %179 = arith.addf %177, %178 : vector<1x8x64xf32>
    %c0_186 = arith.constant 0 : index
    %c0_187 = arith.constant 0 : index
    %c0_188 = arith.constant 0 : index
    %180 = vector.load %arg7[%c0_186, %c0_187, %c0_188] : memref<1x8x64xf32, #tpu.memory_space<vmem>>, vector<1x8x64xf32>
    tpu.vector_store %arg7[%c0_186, %c0_187, %c0_188], %179 {strides = array<i32>} : memref<1x8x64xf32, #tpu.memory_space<vmem>>, vector<1x8x64xf32>,
    return
  }
  func.func @transform_0(%arg0: i32) -> (i32, i32, i32, i32) {
    %c0_i32 = arith.constant 0 : i32
    %c0_i32_0 = arith.constant 0 : i32
    %c0_i32_1 = arith.constant 0 : i32
    %c0_i32_2 = arith.constant 0 : i32
    return %arg0, %c0_i32, %c0_i32_0, %c0_i32_1 : i32, i32, i32, i32
  }
  func.func @transform_1(%arg0: i32) -> (i32, i32, i32, i32) {
    %c0_i32 = arith.constant 0 : i32
    %c0_i32_0 = arith.constant 0 : i32
    %c0_i32_1 = arith.constant 0 : i32
    %c0_i32_2 = arith.constant 0 : i32
    %c0_i32_3 = arith.constant 0 : i32
    return %c0_i32, %c0_i32_0, %c0_i32_1, %c0_i32_2 : i32, i32, i32, i32
  }
  func.func @transform_2(%arg0: i32) -> (i32, i32, i32, i32) {
    %c0_i32 = arith.constant 0 : i32
    %c0_i32_0 = arith.constant 0 : i32
    %c0_i32_1 = arith.constant 0 : i32
    %c0_i32_2 = arith.constant 0 : i32
    %c0_i32_3 = arith.constant 0 : i32
    return %c0_i32, %c0_i32_0, %c0_i32_1, %c0_i32_2 : i32, i32, i32, i32
  }
  func.func @transform_3(%arg0: i32) -> (i32, i32) {
    %c0_i32 = arith.constant 0 : i32
    %c0_i32_0 = arith.constant 0 : i32
    %c0_i32_1 = arith.constant 0 : i32
    return %c0_i32, %c0_i32_0 : i32, i32
  }
  func.func @transform_4(%arg0: i32) -> (i32, i32, i32) {
    %c0_i32 = arith.constant 0 : i32
    %c0_i32_0 = arith.constant 0 : i32
    %c0_i32_1 = arith.constant 0 : i32
    return %arg0, %c0_i32, %c0_i32_0 : i32, i32, i32
  }
  func.func @transform_5(%arg0: i32) -> (i32, i32, i32) {
    %c0_i32 = arith.constant 0 : i32
    %c0_i32_0 = arith.constant 0 : i32
    %c0_i32_1 = arith.constant 0 : i32
    return %arg0, %c0_i32, %c0_i32_0 : i32, i32, i32
  }
  func.func @transform_6(%arg0: i32) -> (i32, i32, i32) {
    %c0_i32 = arith.constant 0 : i32
    %c0_i32_0 = arith.constant 0 : i32
    %c0_i32_1 = arith.constant 0 : i32
    return %arg0, %c0_i32, %c0_i32_0 : i32, i32, i32
  }
}

</mosaic_0001>

<bundles_post_ra>
// kernel: tpu_custom_call.1
= control target key start
LH: loop header
LB: loop body
LE: loop exit
PB: predicated region body
PF: predicated region fallthrough
CT: control target
= control target key end

     0   :  { %12 = vsyncpa [#allocation3], 0  ;;  %s4703_s0 = inlined_call_operand.vmem [shape: f32[2,4,16,16], index: 0, kind: input, shape index: {}]   ;;  %s4704_s1 = inlined_call_operand.vmem [shape: f32[4,4,16,8], index: 1, kind: input, shape index: {}]   ;;  %s4705_s2 = inlined_call_operand.vmem [shape: f32[4,4,8,16], index: 2, kind: input, shape index: {}]   ;;  %s4706_s3 = inlined_call_operand.vmem [shape: f32[8,4], index: 3, kind: input, shape index: {}]   ;;  %s4707_s4 = inlined_call_operand.vmem [shape: f32[2,8,64], index: 4, kind: input, shape index: {}]   ;;  %s4708_s5 = inlined_call_operand.hbm [shape: f32[2,4,64], index: 5, kind: output, shape index: {0}]   ;;  %s4709_s6 = inlined_call_operand.hbm [shape: f32[2,8,64], index: 6, kind: output, shape index: {1}]  }
   0x1   :  { %14 = vsyncpa [#allocation3 + $0x1], 0 }
   0x2   :  { %15 = vsyncpa [#allocation5], 0 }
   0x3   :  { %17 = vsyncpa [#allocation5 + $0x1], 0  ;;  %s4145_s21 = smov 0   ;;  %s4147_s22 = smov 0  }
   0x4   :  { %s4149_s23 = smov 0   ;;  %s4151_s24 = smov 0  }
   0x5 LB: > { %s4166_s25 = sadd.s32 4294967295, %s4094_s24   ;;  %s3348_s26 = sadd.s32 4294967294, %s4094_s24   ;;  %s4094_s24 = sphi %s4151_s24, %s4715_s24   ;;  %s4090_s23 = sphi %s4149_s23, %s4714_s23   ;;  %s4086_s22 = sphi %s4147_s22, %s4713_s22   ;;  %s4082_s21 = sphi %s4145_s21, %s4712_s21  }
   0x6   : > { %s4170_s27 = sadd.s32 1, %s4094_s24   ;;  %s145_s28 = sadd.s32 1, %s4090_s23 }
   0x7   : > { %s142_s29 = ssub.s32 %s4094_s24, %s4170_s27  ;;  %p155_p0 = scmp.ne.s32.totalorder %s4090_s23, %s4086_s22 }
   0x8   : > { %p143_p1 = scmp.eq.s32.totalorder %s142_s29, 0  ;;  %p156_p2 = scmp.eq.s32.totalorder %s4166_s25, 1 }
   0x9   : > { %p161_p3 = scmp.ne.s32.totalorder %s4086_s22, %s4082_s21  ;;  %p162_p4 = scmp.eq.s32.totalorder %s3348_s26, 1 }
   0xa   : > { %s4181_s30 = scalar_select %p143_p1, %s4090_s23, %s145_s28  }
   0xb   : > { %p4183_p5 = por %p156_p2, %p155_p0  ;;  %p4187_p6 = por %p162_p4, %p161_p3 }
   0xc   : > { %p3351_p7 = scmp.ge.s32.totalorder %s4094_s24, 1  ;;  %p230_p8 = scmp.lt.s32.totalorder %s4094_s24, 3 }
   0xe   : > { %p231_p9 = pnand %p3351_p7, %p230_p8 }
   0xf   : > { %v3365_v0 = vld [vmem:[%s4704_s1 + $0x10] sm:$0xff] (!%p231_p9)  ;;  %v3366_v1 = vld [vmem:[%s4704_s1 + $0x18] sm:$0xff] (!%p231_p9)  ;;  %p269_p10 = scmp.lt.s32.totalorder (!%p231_p9), %s4166_s25, 1  ;;  %v289_v2 = vld [vmem:[%s4704_s1] sm:$0xff] (!%p231_p9)  ;;  %vm291_vm0 = vcmask (!%p231_p9), 130048   ;;  %v4096_v56 = vmov (!%p231_p9), 0.0|0.0  }
  0x10   : > { %234 = sbr.rel (%p231_p9) target bundleno = 944 (0x3b0), region = 40  ;;  %v3812_v3 = vpack.c.bf16 (!%p231_p9), %v3366_v1, %v3365_v0  ;;  %v290_v4 = vld [vmem:[%s4704_s1 + $0x8] sm:$0xff] (!%p231_p9)  ;;  %v3372_v5 = vld [vmem:[%s4704_s1 + $0x20] sm:$0xff] (!%p231_p9)  ;;  %v3378_v9 = vld [vmem:[%s4704_s1 + $0x30] sm:$0xff] (!%p231_p9)  ;;  %vm4097_vm1 = vmmov (!%p231_p9), 0   ;;  %v4098_v57 = vmov (!%p231_p9), 0.0  }
  0x11   : > { %v3373_v6 = vld [vmem:[%s4704_s1 + $0x28] sm:$0xff] (!%p231_p9)  ;;  %v3808_v7 = vpack.c.bf16 (!%p231_p9), %v290_v4, %v289_v2  ;;  %v3379_v10 = vld [vmem:[%s4704_s1 + $0x38] sm:$0xff] (!%p231_p9)  ;;  %v3384_v11 = vld [vmem:[%s4704_s1 + $0x40] sm:$0xff] (!%p231_p9)  ;;  %s4102_s12 = smov (!%p231_p9), 16   ;;  %s4103_s13 = smov (!%p231_p9), 32   ;;  %vm2845_vm2 = vcmask (!%p231_p9), 64512  }
  0x12   : > { %v3822_v8 = vpack.c.bf16 (!%p231_p9), %v3373_v6, %v3372_v5  ;;  %3813 = vmatprep.subr.bf16.mxu1 (!%p231_p9), %v3812_v3  ;;  %v3829_v15 = vpack.c.bf16 (!%p231_p9), %v3379_v10, %v3378_v9  ;;  %v3385_v18 = vld [vmem:[%s4704_s1 + $0x48] sm:$0xff] (!%p231_p9)  ;;  %v3389_v22 = vld [vmem:[%s4704_s1 + $0x50] sm:$0xff] (!%p231_p9)  ;;  %v3390_v23 = vld [vmem:[%s4704_s1 + $0x58] sm:$0xff] (!%p231_p9)  ;;  %s4105_s15 = smov (!%p231_p9), 40   ;;  %s4106_s16 = smov (!%p231_p9), 48   ;;  %vm2848_vm3 = vcmask (!%p231_p9), 195584  }
  0x13   : > { %3815 = vmatpush3.bf16.msra.mxu1 (!%p231_p9), %v3812_v3  ;;  %3809 = vmatprep.subr.bf16.mxu0 (!%p231_p9), %v3808_v7  ;;  %v3836_v21 = vpack.c.bf16 (!%p231_p9), %v3385_v18, %v3384_v11  ;;  %v3840_v25 = vpack.c.bf16 (!%p231_p9), %v3390_v23, %v3389_v22  ;;  %v3396_v26 = vld [vmem:[%s4704_s1 + $0x60] sm:$0xff] (!%p231_p9)  ;;  %v3397_v27 = vld [vmem:[%s4704_s1 + $0x68] sm:$0xff] (!%p231_p9)  ;;  %v3402_v29 = vld [vmem:[%s4704_s1 + $0x70] sm:$0xff] (!%p231_p9)  ;;  %s4107_s17 = smov (!%p231_p9), 56   ;;  %vm2850_vm4 = vcmask (!%p231_p9), 261120   ;;  %vm2852_vm5 = vcmask (!%p231_p9), 326656  }
  0x14   : > { %3811 = vmatpush3.bf16.msra.mxu0 (!%p231_p9), %v3808_v7  ;;  %3823 = vmatprep.subr.bf16.mxu1 (!%p231_p9), %v3822_v8  ;;  %v3850_v28 = vpack.c.bf16 (!%p231_p9), %v3397_v27, %v3396_v26  ;;  %v3403_v30 = vld [vmem:[%s4704_s1 + $0x78] sm:$0xff] (!%p231_p9)  ;;  %v3408_v32 = vld [vmem:[%s4704_s1 + $0x80] sm:$0xff] (!%p231_p9)  ;;  %v3409_v33 = vld [vmem:[%s4704_s1 + $0x88] sm:$0xff] (!%p231_p9)  ;;  %vm2854_vm6 = vcmask (!%p231_p9), 392192   ;;  %vm2856_vm7 = vcmask (!%p231_p9), 457728   ;;  %s4612_s18 = sand.u32 (!%p231_p9), 1, %s4086_s22  }
  0x15   : > { %v3857_v31 = vpack.c.bf16 (!%p231_p9), %v3403_v30, %v3402_v29  ;;  %v3864_v34 = vpack.c.bf16 (!%p231_p9), %v3409_v33, %v3408_v32  ;;  %v3413_v35 = vld [vmem:[%s4704_s1 + $0x90] sm:$0xff] (!%p231_p9)  ;;  %v3414_v36 = vld [vmem:[%s4704_s1 + $0x98] sm:$0xff] (!%p231_p9)  ;;  %v3420_v38 = vld [vmem:[%s4704_s1 + $0xa0] sm:$0xff] (!%p231_p9)  ;;  %3816 = vmatprep.subr.bf16.mxu0 (!%p231_p9), %v4096_v56  ;;  %vm3119_vm8 = vcmask (!%p231_p9), 1040384   ;;  %s3352_s19 = sshll.u32 (!%p231_p9), %s4612_s18, 2  ;;  %vm3121_vm9 = vcmask (!%p231_p9), 1041408  }
  0x16   : > { %v3868_v37 = vpack.c.bf16 (!%p231_p9), %v3414_v36, %v3413_v35  ;;  %v3421_v39 = vld [vmem:[%s4704_s1 + $0xa8] sm:$0xff] (!%p231_p9)  ;;  %v3426_v41 = vld [vmem:[%s4704_s1 + $0xb0] sm:$0xff] (!%p231_p9)  ;;  %v3427_v42 = vld [vmem:[%s4704_s1 + $0xb8] sm:$0xff] (!%p231_p9)  ;;  %vm3123_vm10 = vcmask (!%p231_p9), 1042432   ;;  %vm3132_vm11 = vcmask (!%p231_p9), 1043456   ;;  %vm3125_vm12 = vcmask (!%p231_p9), 519168  }
  0x17   : > { %s4213_s26 = scalar_select %p269_p10, %s4166_s25, 1  ;;  %v3878_v40 = vpack.c.bf16 %v3421_v39, %v3420_v38  ;;  %v3885_v43 = vpack.c.bf16 %v3427_v42, %v3426_v41  ;;  %v3432_v44 = vld [vmem:[%s4704_s1 + $0xc0] sm:$0xff]  ;;  %v3433_v45 = vld [vmem:[%s4704_s1 + $0xc8] sm:$0xff]  ;;  %v3437_v47 = vld [vmem:[%s4704_s1 + $0xd0] sm:$0xff]  ;;  %vm3128_vm13 = vcmask 31744  }
  0x18   : > { %v3892_v46 = vpack.c.bf16 %v3433_v45, %v3432_v44  ;;  %v3438_v48 = vld [vmem:[%s4704_s1 + $0xd8] sm:$0xff]  ;;  %v3444_v50 = vld [vmem:[%s4704_s1 + $0xe0] sm:$0xff]  ;;  %v3445_v51 = vld [vmem:[%s4704_s1 + $0xe8] sm:$0xff]  ;;  %s261_s29 = scalar_lea.vmem [#allocation2], %s3352_s19  ;;  %s3460_s9 = sshll.u32 %s4166_s25, 6 }
  0x19   : > { %s3464_s11 = sshll.u32 %s4213_s26, 6  ;;  %v3896_v49 = vpack.c.bf16 %v3438_v48, %v3437_v47  ;;  %v3906_v52 = vpack.c.bf16 %v3445_v51, %v3444_v50  ;;  %v3450_v53 = vld [vmem:[%s4704_s1 + $0xf0] sm:$0xff]  ;;  %v3451_v54 = vld [vmem:[%s4704_s1 + $0xf8] sm:$0xff]  ;;  %v3369_v0 = vld [vmem:[%s4705_s2 + $0x8] sm:$0xff] }
  0x1a   : > { %s273_s14 = scalar_lea.vmem %s4703_s0, %s3464_s11  ;;  %v3913_v55 = vpack.c.bf16 %v3451_v54, %v3450_v53  ;;  %v373_v7 = vld [vmem:[%s4705_s2] sm:$0xff]  ;;  %v3400_v39 = vld [vmem:[%s4705_s2 + $0x30] sm:$0xff]  ;;  %v3417_v50 = vld [vmem:[%s4705_s2 + $0x48] sm:$0xff]  ;;  %s4101_s11 = smov 8  }
  0x1b   : > { %v4228_v12 = vld [vmem:[%s273_s14 + $0x10] sm:$0xff]  ;;  %v4230_v13 = vld [vmem:[%s273_s14 + $0x18] sm:$0xff]  ;;  %v4232_v14 = vld [vmem:[%s273_s14] sm:$0xff] }
  0x1c   : > { %3590 = vmatprep.mubr.msk.f32.mxu1 %vm291_vm0, %v4228_v12  ;;  %3583 = vmatprep.mubr.msk.f32.mxu0 %vm291_vm0, %v4232_v14  ;;  %v4238_v16 = vld [vmem:[%s273_s14 + $0x8] sm:$0xff]  ;;  %v4240_v17 = vld [vmem:[%s273_s14 + $0x20] sm:$0xff]  ;;  %v4253_v20 = vld [vmem:[%s273_s14 + $0x30] sm:$0xff] }
  0x1d   : > { %3591 = vmatmul.mubr.msk.f32.vlgmr.msra.gmra.mrb[0].mxu1 %vm291_vm0, %v4230_v13  ;;  %3584 = vmatmul.mubr.msk.f32.vlgmr.msra.gmra.mrb[0].mxu0 %vm291_vm0, %v4238_v16  ;;  %v4251_v19 = vld [vmem:[%s273_s14 + $0x28] sm:$0xff]  ;;  %v4265_v24 = vld [vmem:[%s273_s14 + $0x38] sm:$0xff]  ;;  %v3388_v32 = vld [vmem:[%s4705_s2 + $0x20] sm:$0xff]  ;;  %s4104_s14 = smov 24  }
  0x1e   : > { %3825 = vmatpush3.bf16.msra.mxu1 %v3822_v8  ;;  %3611 = vmatprep.mubr.msk.f32.mxu1 %vm291_vm0, %v4240_v17  ;;  %v3412_v51 = vld [vmem:[%s4705_s2 + $0x40] sm:$0xff]  ;;  %v3430_v53 = vld [vmem:[%s4705_s2 + $0x58] sm:$0xff]  ;;  %v3441_v54 = vld [vmem:[%s4705_s2 + $0x68] sm:$0xff] }
  0x1f   : > { %3830 = vmatprep.subr.bf16.mxu1 %v3829_v15  ;;  %3597 = vmatprep.mubr.msk.f32.mxu0 %vm4097_vm1, %v4098_v57 }
  0x21   : > { %3612 = vmatmul.mubr.msk.f32.vlgmr.msra.gmra.mrb[2].mxu1 %vm291_vm0, %v4251_v19 }
  0x22   : > { %3832 = vmatpush3.bf16.msra.mxu1 %v3829_v15  ;;  %3625 = vmatprep.mubr.msk.f32.mxu1 %vm291_vm0, %v4253_v20 }
  0x23   : > { %3837 = vmatprep.subr.bf16.mxu1 %v3836_v21 }
  0x25   : > { %3626 = vmatmul.mubr.msk.f32.vlgmr.msra.gmra.mrb[4].mxu1 %vm291_vm0, %v4265_v24 }
  0x26   : > { %3839 = vmatpush3.bf16.msra.mxu1 %v3836_v21  ;;  %3639 = vmatprep.mubr.msk.f32.mxu1 %vm291_vm0, %v4232_v14  ;;  %v3382_v21 = vld [vmem:[%s4705_s2 + $0x18] sm:$0xff] }
  0x27   : > { %3841 = vmatprep.subr.bf16.mxu1 %v3840_v25 }
  0x29   : > { %3640 = vmatmul.mubr.msk.f32.vlgmr.msra.gmra.mrb[6].mxu1 %vm291_vm0, %v4238_v16 }
  0x2a   : > { %3843 = vmatpush3.bf16.msra.mxu1 %v3840_v25  ;;  %3646 = vmatprep.mubr.msk.f32.mxu1 %vm291_vm0, %v4228_v12  ;;  %v3393_v25 = vld [vmem:[%s4705_s2 + $0x28] sm:$0xff] }
  0x2b   : > { %3851 = vmatprep.subr.bf16.mxu1 %v3850_v28 }
  0x2d   : > { %3647 = vmatmul.mubr.msk.f32.vlgmr.msra.gmra.mrb[8].mxu1 %vm291_vm0, %v4230_v13 }
  0x2e   : > { %3853 = vmatpush3.bf16.msra.mxu1 %v3850_v28  ;;  %3667 = vmatprep.mubr.msk.f32.mxu1 %vm291_vm0, %v4240_v17 }
  0x2f   : > { %3858 = vmatprep.subr.bf16.mxu1 %v3857_v31 }
  0x31   : > { %3668 = vmatmul.mubr.msk.f32.vlgmr.msra.gmra.mrb[10].mxu1 %vm291_vm0, %v4251_v19 }
  0x32   : > { %3860 = vmatpush3.bf16.msra.mxu1 %v3857_v31  ;;  %3681 = vmatprep.mubr.msk.f32.mxu1 %vm291_vm0, %v4253_v20 }
  0x33   : > { %3865 = vmatprep.subr.bf16.mxu1 %v3864_v34 }
  0x35   : > { %3682 = vmatmul.mubr.msk.f32.vlgmr.msra.gmra.mrb[12].mxu1 %vm291_vm0, %v4265_v24 }
  0x36   : > { %3867 = vmatpush3.bf16.msra.mxu1 %v3864_v34  ;;  %3695 = vmatprep.mubr.msk.f32.mxu1 %vm291_vm0, %v4232_v14 }
  0x37   : > { %3869 = vmatprep.subr.bf16.mxu1 %v3868_v37 }
  0x39   : > { %3696 = vmatmul.mubr.msk.f32.vlgmr.msra.gmra.mrb[14].mxu1 %vm291_vm0, %v4238_v16 }
  0x3a   : > { %3871 = vmatpush3.bf16.msra.mxu1 %v3868_v37  ;;  %3702 = vmatprep.mubr.msk.f32.mxu1 %vm291_vm0, %v4228_v12 }
  0x3b   : > { %3879 = vmatprep.subr.bf16.mxu1 %v3878_v40 }
  0x3d   : > { %3703 = vmatmul.mubr.msk.f32.vlgmr.msra.gmra.mrb[16].mxu1 %vm291_vm0, %v4230_v13 }
  0x3e   : > { %3881 = vmatpush3.bf16.msra.mxu1 %v3878_v40  ;;  %3723 = vmatprep.mubr.msk.f32.mxu1 %vm291_vm0, %v4240_v17 }
  0x3f   : > { %3886 = vmatprep.subr.bf16.mxu1 %v3885_v43 }
  0x41   : > { %3724 = vmatmul.mubr.msk.f32.vlgmr.msra.gmra.mrb[18].mxu1 %vm291_vm0, %v4251_v19 }
  0x42   : > { %3888 = vmatpush3.bf16.msra.mxu1 %v3885_v43  ;;  %3737 = vmatprep.mubr.msk.f32.mxu1 %vm291_vm0, %v4253_v20 }
  0x43   : > { %3893 = vmatprep.subr.bf16.mxu1 %v3892_v46 }
  0x45   : > { %3738 = vmatmul.mubr.msk.f32.vlgmr.msra.gmra.mrb[20].mxu1 %vm291_vm0, %v4265_v24 }
  0x46   : > { %3895 = vmatpush3.bf16.msra.mxu1 %v3892_v46  ;;  %3751 = vmatprep.mubr.msk.f32.mxu1 %vm291_vm0, %v4232_v14  ;;  %v3376_v14 = vld [vmem:[%s4705_s2 + $0x10] sm:$0xff]  ;;  %v3406_v46 = vld [vmem:[%s4705_s2 + $0x38] sm:$0xff] }
  0x47   : > { %3897 = vmatprep.subr.bf16.mxu1 %v3896_v49 }
  0x49   : > { %3752 = vmatmul.mubr.msk.f32.vlgmr.msra.gmra.mrb[22].mxu1 %vm291_vm0, %v4238_v16 }
  0x4a   : > { %3899 = vmatpush3.bf16.msra.mxu1 %v3896_v49  ;;  %3758 = vmatprep.mubr.msk.f32.mxu1 %vm291_vm0, %v4228_v12 }
  0x4b   : > { %3907 = vmatprep.subr.bf16.mxu1 %v3906_v52 }
  0x4d   : > { %3759 = vmatmul.mubr.msk.f32.vlgmr.msra.gmra.mrb[24].mxu1 %vm291_vm0, %v4230_v13 }
  0x4e   : > { %3909 = vmatpush3.bf16.msra.mxu1 %v3906_v52  ;;  %3779 = vmatprep.mubr.msk.f32.mxu1 %vm291_vm0, %v4240_v17  ;;  %v3424_v52 = vld [vmem:[%s4705_s2 + $0x50] sm:$0xff] }
  0x4f   : > { %3914 = vmatprep.subr.bf16.mxu1 %v3913_v55 }
  0x51   : > { %3780 = vmatmul.mubr.msk.f32.vlgmr.msra.gmra.mrb[26].mxu1 %vm291_vm0, %v4251_v19 }
  0x52   : > { %3916 = vmatpush3.bf16.msra.mxu1 %v3913_v55  ;;  %3793 = vmatprep.mubr.msk.f32.mxu1 %vm291_vm0, %v4253_v20  ;;  %v3436_v55 = vld [vmem:[%s4705_s2 + $0x60] sm:$0xff] }
  0x53   : > { %3803 = vmatprep.subr.mxu1 %v4098_v57 }
  0x55   : > { %3794 = vmatmul.mubr.msk.f32.vlgmr.msra.gmra.mrb[28].mxu1 %vm291_vm0, %v4265_v24 }
  0x56   : > { %3805 = vmatprep.mubr.msk.f32.mxu1 %vm4097_vm1, %v4098_v57 }
  0xf0   : > { %v3592_v58 = vpop.f32.mrb[0].mxu1  ;;  %v3585_v59 = vpop.f32.mrb[0].mxu0 }
  0xf1   : > { %v449_v60 = vpop.f32.mrb[1].mxu1  ;;  %v364_v61 = vpop.f32.mrb[1].mxu0 }
  0xf2   : > { %v3817_v62 = vpack.c.bf16 %v3592_v58, %v449_v60  ;;  %v3820_v63 = vpack.c.bf16 %v3585_v59, %v364_v61  ;;  %v3448_v58 = vld [vmem:[%s4705_s2 + $0x70] sm:$0xff]  ;;  %v3454_v59 = vld [vmem:[%s4705_s2 + $0x78] sm:$0xff]  ;;  %v4099_v60 = vmov 1983009808  }
  0xf3   : > { %v2770_v61 = vunpack.c.l.s4 %v4099_v60 }
  0xf4   : > { %3818 = vmatpush3.bf16.msra.mxu0 %v3817_v62  ;;  %v3613_v1 = vpop.f32.mrb[2].mxu1  ;;  %v2772_v62 = vlaneseq }
  0xf5   : > { %3819 = vmatprep.subr.bf16.mxu0 %v4096_v56  ;;  %v681_v2 = vpop.f32.mrb[3].mxu1 }
  0xf6   : > { %v3827_v3 = vpack.c.bf16 %v3613_v1, %v681_v2  ;;  %v2773_v1 = vshrl.u32 %v2772_v62, 7 }
  0xf7   : > { %3598 = vmatmul.mubr.msk.f32.vlgmr.msra.gmra.mrb[2].mxu0 %vm291_vm0, %v3369_v0  ;;  %v2771_v0 = vunpack.c.0.s8 %v2770_v61 }
  0xf8   : > { %3821 = vmatpush3.bf16.msra.mxu0 %v3820_v63  ;;  %3604 = vmatprep.mubr.msk.f32.mxu0 %vm4097_vm1, %v4098_v57  ;;  %v3627_v4 = vpop.f32.mrb[4].mxu1 }
  0xf9   : > { %3826 = vmatprep.subr.bf16.mxu0 %v4096_v56  ;;  %v841_v5 = vpop.f32.mrb[5].mxu1 }
  0xfa   : > { %v3834_v6 = vpack.c.bf16 %v3627_v4, %v841_v5 }
  0xfc   : > { %v3641_v8 = vpop.f32.mrb[6].mxu1 }
  0xfd   : > { %v995_v9 = vpop.f32.mrb[7].mxu1 }
  0xfe   : > { %v3848_v10 = vpack.c.bf16 %v3641_v8, %v995_v9 }
  0xff   : > { %3605 = vmatmul.mubr.msk.f32.vlgmr.msra.gmra.mrb[2].mxu0 %vm291_vm0, %v373_v7 }
 0x100   : > { %3828 = vmatpush3.bf16.msra.mxu0 %v3827_v3  ;;  %3618 = vmatprep.mubr.msk.f32.mxu0 %vm4097_vm1, %v4098_v57  ;;  %v3648_v11 = vpop.f32.mrb[8].mxu1  ;;  %v4492_v3 = vsub.s32 %v2771_v0, %v2773_v1 }
 0x101   : > { %3833 = vmatprep.subr.bf16.mxu0 %v4096_v56  ;;  %v1075_v12 = vpop.f32.mrb[9].mxu1 }
 0x102   : > { %v3845_v13 = vpack.c.bf16 %v3648_v11, %v1075_v12 }
 0x104   : > { %v3669_v15 = vpop.f32.mrb[10].mxu1 }
 0x105   : > { %v1301_v16 = vpop.f32.mrb[11].mxu1 }
 0x106   : > { %v3855_v17 = vpack.c.bf16 %v3669_v15, %v1301_v16 }
 0x107   : > { %3619 = vmatmul.mubr.msk.f32.vlgmr.msra.gmra.mrb[2].mxu0 %vm291_vm0, %v3376_v14 }
 0x108   : > { %3835 = vmatpush3.bf16.msra.mxu0 %v3834_v6  ;;  %3632 = vmatprep.mubr.msk.f32.mxu0 %vm4097_vm1, %v4098_v57  ;;  %v3683_v18 = vpop.f32.mrb[12].mxu1 }
 0x109   : > { %3844 = vmatprep.subr.bf16.mxu0 %v4096_v56  ;;  %v1455_v19 = vpop.f32.mrb[13].mxu1 }
 0x10a   : > { %v3862_v20 = vpack.c.bf16 %v3683_v18, %v1455_v19 }
 0x10c   : > { %v3697_v22 = vpop.f32.mrb[14].mxu1 }
 0x10d   : > { %v1609_v23 = vpop.f32.mrb[15].mxu1 }
 0x10e   : > { %v3876_v24 = vpack.c.bf16 %v3697_v22, %v1609_v23 }
 0x10f   : > { %3633 = vmatmul.mubr.msk.f32.vlgmr.msra.gmra.mrb[2].mxu0 %vm291_vm0, %v3382_v21 }
 0x110   : > { %3846 = vmatpush3.bf16.msra.mxu0 %v3845_v13  ;;  %3653 = vmatprep.mubr.msk.f32.mxu0 %vm4097_vm1, %v4098_v57  ;;  %v3704_v26 = vpop.f32.mrb[16].mxu1 }
 0x111   : > { %3847 = vmatprep.subr.bf16.mxu0 %v4096_v56  ;;  %v1689_v27 = vpop.f32.mrb[17].mxu1 }
 0x112   : > { %v3873_v28 = vpack.c.bf16 %v3704_v26, %v1689_v27 }
 0x113   : > { %3654 = vmatmul.mubr.msk.f32.vlgmr.msra.gmra.mrb[4].mxu0 %vm291_vm0, %v3393_v25 }
 0x114   : > { %3849 = vmatpush3.bf16.msra.mxu0 %v3848_v10  ;;  %3660 = vmatprep.mubr.msk.f32.mxu0 %vm4097_vm1, %v4098_v57  ;;  %v3725_v29 = vpop.f32.mrb[18].mxu1 }
 0x115   : > { %3854 = vmatprep.subr.bf16.mxu0 %v4096_v56  ;;  %v1915_v30 = vpop.f32.mrb[19].mxu1 }
 0x116   : > { %v3883_v31 = vpack.c.bf16 %v3725_v29, %v1915_v30 }
 0x118   : > { %v3739_v33 = vpop.f32.mrb[20].mxu1 }
 0x119   : > { %v2069_v34 = vpop.f32.mrb[21].mxu1 }
 0x11a   : > { %v3890_v35 = vpack.c.bf16 %v3739_v33, %v2069_v34 }
 0x11b   : > { %3661 = vmatmul.mubr.msk.f32.vlgmr.msra.gmra.mrb[4].mxu0 %vm291_vm0, %v3388_v32 }
 0x11c   : > { %3856 = vmatpush3.bf16.msra.mxu0 %v3855_v17  ;;  %3674 = vmatprep.mubr.msk.f32.mxu0 %vm4097_vm1, %v4098_v57  ;;  %v3753_v36 = vpop.f32.mrb[22].mxu1 }
 0x11d   : > { %3861 = vmatprep.subr.bf16.mxu0 %v4096_v56  ;;  %v2223_v37 = vpop.f32.mrb[23].mxu1 }
 0x11e   : > { %v3904_v38 = vpack.c.bf16 %v3753_v36, %v2223_v37 }
 0x120   : > { %v3760_v40 = vpop.f32.mrb[24].mxu1 }
 0x121   : > { %v2303_v41 = vpop.f32.mrb[25].mxu1 }
 0x122   : > { %v3901_v42 = vpack.c.bf16 %v3760_v40, %v2303_v41 }
 0x123   : > { %3675 = vmatmul.mubr.msk.f32.vlgmr.msra.gmra.mrb[4].mxu0 %vm291_vm0, %v3400_v39 }
 0x124   : > { %3863 = vmatpush3.bf16.msra.mxu0 %v3862_v20  ;;  %3688 = vmatprep.mubr.msk.f32.mxu0 %vm4097_vm1, %v4098_v57  ;;  %v3781_v43 = vpop.f32.mrb[26].mxu1 }
 0x125   : > { %3872 = vmatprep.subr.bf16.mxu0 %v4096_v56  ;;  %v2529_v44 = vpop.f32.mrb[27].mxu1 }
 0x126   : > { %v3911_v45 = vpack.c.bf16 %v3781_v43, %v2529_v44 }
 0x128   : > { %v3795_v47 = vpop.f32.mrb[28].mxu1 }
 0x129   : > { %v2683_v48 = vpop.f32.mrb[29].mxu1 }
 0x12a   : > { %v3918_v49 = vpack.c.bf16 %v3795_v47, %v2683_v48 }
 0x12b   : > { %3689 = vmatmul.mubr.msk.f32.vlgmr.msra.gmra.mrb[4].mxu0 %vm291_vm0, %v3406_v46 }
 0x12c   : > { %3874 = vmatpush3.bf16.msra.mxu0 %v3873_v28  ;;  %3709 = vmatprep.mubr.msk.f32.mxu0 %vm4097_vm1, %v4098_v57 }
 0x12d   : > { %3875 = vmatprep.subr.bf16.mxu0 %v4096_v56 }
 0x12f   : > { %3710 = vmatmul.mubr.msk.f32.vlgmr.msra.gmra.mrb[6].mxu0 %vm291_vm0, %v3417_v50 }
 0x130   : > { %3877 = vmatpush3.bf16.msra.mxu0 %v3876_v24  ;;  %3716 = vmatprep.mubr.msk.f32.mxu0 %vm4097_vm1, %v4098_v57 }
 0x131   : > { %3882 = vmatprep.subr.bf16.mxu0 %v4096_v56 }
 0x137   : > { %3717 = vmatmul.mubr.msk.f32.vlgmr.msra.gmra.mrb[6].mxu0 %vm291_vm0, %v3412_v51 }
 0x138   : > { %3884 = vmatpush3.bf16.msra.mxu0 %v3883_v31  ;;  %3730 = vmatprep.mubr.msk.f32.mxu0 %vm4097_vm1, %v4098_v57 }
 0x139   : > { %3889 = vmatprep.subr.bf16.mxu0 %v4096_v56 }
 0x13f   : > { %3731 = vmatmul.mubr.msk.f32.vlgmr.msra.gmra.mrb[6].mxu0 %vm291_vm0, %v3424_v52 }
 0x140   : > { %3891 = vmatpush3.bf16.msra.mxu0 %v3890_v35  ;;  %3744 = vmatprep.mubr.msk.f32.mxu0 %vm4097_vm1, %v4098_v57 }
 0x141   : > { %3900 = vmatprep.subr.bf16.mxu0 %v4096_v56 }
 0x147   : > { %3745 = vmatmul.mubr.msk.f32.vlgmr.msra.gmra.mrb[6].mxu0 %vm291_vm0, %v3430_v53 }
 0x148   : > { %3902 = vmatpush3.bf16.msra.mxu0 %v3901_v42  ;;  %3765 = vmatprep.mubr.msk.f32.mxu0 %vm4097_vm1, %v4098_v57 }
 0x149   : > { %3903 = vmatprep.subr.bf16.mxu0 %v4096_v56 }
 0x14b   : > { %3766 = vmatmul.mubr.msk.f32.vlgmr.msra.gmra.mrb[8].mxu0 %vm291_vm0, %v3441_v54 }
 0x14c   : > { %3905 = vmatpush3.bf16.msra.mxu0 %v3904_v38  ;;  %3772 = vmatprep.mubr.msk.f32.mxu0 %vm4097_vm1, %v4098_v57 }
 0x14d   : > { %3910 = vmatprep.subr.bf16.mxu0 %v4096_v56 }
 0x153   : > { %3773 = vmatmul.mubr.msk.f32.vlgmr.msra.gmra.mrb[8].mxu0 %vm291_vm0, %v3436_v55 }
 0x154   : > { %3912 = vmatpush3.bf16.msra.mxu0 %v3911_v45  ;;  %3786 = vmatprep.mubr.msk.f32.mxu0 %vm4097_vm1, %v4098_v57 }
 0x155   : > { %3917 = vmatprep.subr.bf16.mxu0 %v4096_v56  ;;  %v4100_v56 = vmov 1934713408  }
 0x156   : > { %v2785_v63 = vunpack.c.l.s4 %v4100_v56 }
 0x158   : > { %v2786_v2 = vunpack.c.0.s8 %v2785_v63 }
 0x15a   : > { %v4494_v4 = vsub.s32 %v2786_v2, %v2773_v1 }
 0x15b   : > { %3787 = vmatmul.mubr.msk.f32.vlgmr.msra.gmra.mrb[8].mxu0 %vm291_vm0, %v3448_v58 }
 0x15c   : > { %3919 = vmatpush3.bf16.msra.mxu0 %v3918_v49  ;;  %3800 = vmatprep.mubr.msk.f32.mxu0 %vm4097_vm1, %v4098_v57 }
 0x163   : > { %3801 = vmatmul.mubr.msk.f32.vlgmr.msra.gmra.mrb[8].mxu0 %vm291_vm0, %v3454_v59 }
 0x1e2   : > { %v921_v5 = vpop.f32.mrb[2].mxu0 }
 0x1e3   : > { %v2775_v6 = vrot.slane %v921_v5, %v4492_v3  ;;  %v3634_v7 = vpop.f32.mrb[3].mxu0  ;;  %v2768_v9 = vcombine.high %v921_v5, %v4098_v57 }
 0x1e5   : > { %v4498_v8 = vrot.slane %v2775_v6, %v4494_v4  ;;  %v2783_v10 = vcombine.high %v2775_v6, %v4098_v57  ;;  %v2782_v12 = vrot.slane %v2768_v9, %v4492_v3 }
 0x1e7   : > { %v2813_v11 = vcombine.high %v4498_v8, %v4098_v57  ;;  %v2797_v13 = vrot.slane %v2783_v10, %v4494_v4  ;;  %v2805_v14 = vrot.slane %v2782_v12, %v4494_v4  ;;  %v2798_v16 = vcombine.high %v2782_v12, %v4098_v57 }
 0x1e9   : > { %2818 = vrot.lane.b32.xlu1 %v2813_v11, %s4101_s11  ;;  %v2814_v15 = vcombine.high %v2797_v13, %v4098_v57  ;;  %v2815_v17 = vcombine.high %v2805_v14, %v4098_v57  ;;  %v4516_v18 = vrot.slane %v2798_v16, %v4494_v4 }
 0x1eb   : > { %v2816_v1 = vcombine.high %v4516_v18, %v4098_v57 }
 0x1ed   : > { %2822 = vrot.lane.b32.xlu1 %v2797_v13, %s4102_s12 }
 0x1f1   : > { %2830 = vrot.lane.b32.xlu1 %v2805_v14, %s4103_s13 }
 0x1f5   : > { %2826 = vrot.lane.b32.xlu1 %v2814_v15, %s4104_s14 }
 0x1f9   : > { %2834 = vrot.lane.b32.xlu1 %v2815_v17, %s4105_s15 }
 0x1fd   : > { %2838 = vrot.lane.b32.xlu1 %v4516_v18, %s4106_s16 }
 0x1fe   : > { %v1535_v19 = vpop.f32.mrb[4].mxu0 }
 0x1ff   : > { %v2865_v20 = vrot.slane %v1535_v19, %v4492_v3  ;;  %v3690_v21 = vpop.f32.mrb[5].mxu0  ;;  %v2858_v23 = vcombine.high %v1535_v19, %v4098_v57 }
 0x201   : > { %v4522_v22 = vrot.slane %v2865_v20, %v4494_v4  ;;  %v2873_v24 = vcombine.high %v2865_v20, %v4098_v57  ;;  %v2872_v26 = vrot.slane %v2858_v23, %v4492_v3 }
 0x203   : > { %v2903_v25 = vcombine.high %v4522_v22, %v4098_v57  ;;  %v2887_v27 = vrot.slane %v2873_v24, %v4494_v4  ;;  %v2895_v28 = vrot.slane %v2872_v26, %v4494_v4  ;;  %v2888_v30 = vcombine.high %v2872_v26, %v4098_v57 }
 0x205   : > { %2908 = vrot.lane.b32.xlu0 %v2903_v25, %s4101_s11  ;;  %v2904_v29 = vcombine.high %v2887_v27, %v4098_v57  ;;  %v2905_v31 = vcombine.high %v2895_v28, %v4098_v57  ;;  %v2902_v32 = vrot.slane %v2888_v30, %v4494_v4 }
 0x207   : > { %v2906_v37 = vcombine.high %v2902_v32, %v4098_v57 }
 0x209   : > { %2912 = vrot.lane.b32.xlu0 %v2887_v27, %s4102_s12 }
 0x20d   : > { %2920 = vrot.lane.b32.xlu0 %v2895_v28, %s4103_s13 }
 0x211   : > { %2916 = vrot.lane.b32.xlu0 %v2904_v29, %s4104_s14 }
 0x215   : > { %2924 = vrot.lane.b32.xlu0 %v2905_v31, %s4105_s15 }
 0x219   : > { %2928 = vrot.lane.b32.xlu0 %v2902_v32, %s4106_s16 }
 0x21a   : > { %v2149_v33 = vpop.f32.mrb[6].mxu0 }
 0x21b   : > { %v2942_v34 = vcombine.high %v2149_v33, %v4098_v57  ;;  %v2949_v35 = vrot.slane %v2149_v33, %v4492_v3  ;;  %v3746_v36 = vpop.f32.mrb[7].mxu0 }
 0x21d   : > { %v2956_v38 = vrot.slane %v2942_v34, %v4492_v3  ;;  %v4546_v39 = vrot.slane %v2949_v35, %v4494_v4  ;;  %2932 = vrot.lane.b32.xlu0 %v2906_v37, %s4107_s17  ;;  %v2957_v40 = vcombine.high %v2949_v35, %v4098_v57 }
 0x21f   : > { %v2972_v41 = vcombine.high %v2956_v38, %v4098_v57  ;;  %v2987_v42 = vcombine.high %v4546_v39, %v4098_v57  ;;  %v2971_v44 = vrot.slane %v2957_v40, %v4494_v4  ;;  %v2979_v46 = vrot.slane %v2956_v38, %v4494_v4 }
 0x221   : > { %2992 = vrot.lane.b32.xlu1 %v2987_v42, %s4101_s11  ;;  %v2986_v43 = vrot.slane %v2972_v41, %v4494_v4  ;;  %v2988_v47 = vcombine.high %v2971_v44, %v4098_v57  ;;  %v2989_v48 = vcombine.high %v2979_v46, %v4098_v57 }
 0x223   : > { %v2990_v45 = vcombine.high %v2986_v43, %v4098_v57 }
 0x225   : > { %2996 = vrot.lane.b32.xlu1 %v2971_v44, %s4102_s12  ;;  %3016 = vrot.lane.b32.xlu0 %v2990_v45, %s4107_s17 }
 0x229   : > { %3004 = vrot.lane.b32.xlu1 %v2979_v46, %s4103_s13 }
 0x22d   : > { %3000 = vrot.lane.b32.xlu1 %v2988_v47, %s4104_s14 }
 0x231   : > { %3008 = vrot.lane.b32.xlu1 %v2989_v48, %s4105_s15 }
 0x235   : > { %3012 = vrot.lane.b32.xlu1 %v2986_v43, %s4106_s16 }
 0x236   : > { %v2763_v49 = vpop.f32.mrb[8].mxu0 }
 0x237   : > { %v3026_v50 = vcombine.high %v2763_v49, %v4098_v57  ;;  %v3033_v51 = vrot.slane %v2763_v49, %v4492_v3  ;;  %v3802_v52 = vpop.f32.mrb[9].mxu0 }
 0x239   : > { %v3040_v53 = vrot.slane %v3026_v50, %v4492_v3  ;;  %v3048_v54 = vrot.slane %v3033_v51, %v4494_v4  ;;  %v3041_v55 = vcombine.high %v3033_v51, %v4098_v57 }
 0x23b   : > { %v3056_v58 = vcombine.high %v3040_v53, %v4098_v57  ;;  %v3071_v59 = vcombine.high %v3048_v54, %v4098_v57  ;;  %v3055_v61 = vrot.slane %v3041_v55, %v4494_v4  ;;  %v3063_v56 = vrot.slane %v3040_v53, %v4494_v4 }
 0x23d   : > { %3076 = vrot.lane.b32.xlu0 %v3071_v59, %s4101_s11  ;;  %v3070_v60 = vrot.slane %v3056_v58, %v4494_v4  ;;  %v3072_v63 = vcombine.high %v3055_v61, %v4098_v57  ;;  %v3073_v0 = vcombine.high %v3063_v56, %v4098_v57 }
 0x23f   : > { %3096 = vrot.lane.b32.xlu1 %v3070_v60, %s4106_s16  ;;  %v3074_v62 = vcombine.high %v3070_v60, %v4098_v57  ;;  %s4108_s16 = smov [#allocation2]  }
 0x241   : > { %3080 = vrot.lane.b32.xlu0 %v3055_v61, %s4102_s12  ;;  %s4631_s12 = scalar_lea.hbm %s4708_s5, %s3460_s9 }
 0x243   : > { %3100 = vrot.lane.b32.xlu1 %v3074_v62, %s4107_s17 }
 0x245   : > { %3088 = vrot.lane.b32.xlu0 %v3063_v56, %s4103_s13  ;;  %s3232_s13 = sshll.u32 %s261_s29, 4  ;;  %s3233_s13 = int_to_ptr.vmem [resolvable:$true] %s3232_s13 }
 0x249   : > { %3084 = vrot.lane.b32.xlu0 %v3072_v63, %s4104_s14  ;;  %v3127_v63 = vld [vmem:[%s4706_s3] sm:$0xff]  ;;  %s3214_s14 = scalar_lea.sflag [#allocation3], %s4612_s18 }
 0x24d   : > { %3092 = vrot.lane.b32.xlu0 %v3073_v0, %s4105_s15  ;;  %s4000_s15 = scalar_lea.vmem %s3233_s13, 64 }
 0x24e   : > { %p4001_p11 = scmp.ne.s32.totalorder %s3233_s13, %s4000_s15 }
 0x250   : > { %p4002_p12 = pnand %p4001_p11, %p4183_p5 }
 0x251   : > { %2842 = vrot.lane.b32.xlu0 %v2816_v1, %s4107_s17  ;;  %s4004_s17 = sshll.u32 %s4108_s16, 4  ;;  %s4005_s17 = int_to_ptr.vmem [resolvable:$false] %s4004_s17 }
 0x252   : > { %p4003_p13 = pneg %p4002_p12  ;;  %s4006_s19 = scalar_lea.vmem %s4005_s17, 128 }
 0x253   : > { %p4007_p0 = scmp.lt.s32.totalorder %s3233_s13, %s4005_s17  ;;  %p4008_p1 = scmp.lt.s32.totalorder %s4006_s19, %s4000_s15 }
 0x255   : > { %p4009_p2 = por %p4008_p1, %p4007_p0 }
 0x257   : > { %p4010_p3 = pnand %p4009_p2, %p4003_p13 }
 0x25b   : > { %v2819_v2 = vpop.permute.xlu1 %2818 }
 0x25f   : > { %v2823_v3 = vpop.permute.xlu1 %2822 }
 0x263   : > { %v2831_v5 = vpop.permute.xlu1 %2830 }
 0x267   : > { %v2827_v4 = vpop.permute.xlu1 %2826 }
 0x26b   : > { %v2835_v9 = vpop.permute.xlu1 %2834 }
 0x26f   : > { %v2839_v11 = vpop.permute.xlu1 %2838 }
 0x277   : > { %v2909_v6 = vpop.permute.xlu0 %2908 }
 0x278   : > { %v2935_v27 = vsel %vm2845_vm2, %v4522_v22, %v2909_v6  ;;  %v2846_v22 = vsel %vm2845_vm2, %v4498_v8, %v2819_v2 }
 0x279   : > { %v2847_v38 = vsel %vm291_vm0, %v2846_v22, %v2823_v3 }
 0x27a   : > { %v2849_v41 = vsel %vm2848_vm3, %v2847_v38, %v2827_v4 }
 0x27b   : > { %v2913_v7 = vpop.permute.xlu0 %2912  ;;  %v2851_v48 = vsel %vm2850_vm4, %v2849_v41, %v2831_v5 }
 0x27c   : > { %v2936_v29 = vsel %vm291_vm0, %v2935_v27, %v2913_v7  ;;  %v2853_v52 = vsel %vm2852_vm5, %v2851_v48, %v2835_v9 }
 0x27f   : > { %v2921_v10 = vpop.permute.xlu0 %2920 }
 0x283   : > { %v2917_v12 = vpop.permute.xlu0 %2916 }
 0x284   : > { %v2937_v31 = vsel %vm2848_vm3, %v2936_v29, %v2917_v12 }
 0x287   : > { %v2925_v14 = vpop.permute.xlu0 %2924 }
 0x28b   : > { %v2929_v16 = vpop.permute.xlu0 %2928 }
 0x28f   : > { %v2933_v19 = vpop.permute.xlu0 %2932 }
 0x293   : > { %v2993_v13 = vpop.permute.xlu1 %2992 }
 0x294   : > { %v3019_v24 = vsel %vm2845_vm2, %v4546_v39, %v2993_v13  ;;  %v2938_v39 = vsel %vm2850_vm4, %v2937_v31, %v2921_v10 }
 0x295   : > { %v2939_v42 = vsel %vm2852_vm5, %v2938_v39, %v2925_v14 }
 0x296   : > { %v2940_v8 = vsel %vm2854_vm6, %v2939_v42, %v2929_v16 }
 0x297   : > { %v2997_v15 = vpop.permute.xlu1 %2996  ;;  %v3017_v20 = vpop.permute.xlu0 %3016  ;;  %v2941_v46 = vsel %vm2856_vm7, %v2940_v8, %v2933_v19 }
 0x298   : > { %v3020_v28 = vsel %vm291_vm0, %v3019_v24, %v2997_v15  ;;  %v3111_v55 = vrot.slane %v2941_v46, 7 }
 0x29b   : > { %v3005_v17 = vpop.permute.xlu1 %3004 }
 0x29f   : > { %v3001_v57 = vpop.permute.xlu1 %3000 }
 0x2a0   : > { %v3021_v30 = vsel %vm2848_vm3, %v3020_v28, %v3001_v57 }
 0x2a1   : > { %v3022_v36 = vsel %vm2850_vm4, %v3021_v30, %v3005_v17 }
 0x2a3   : > { %v3009_v21 = vpop.permute.xlu1 %3008 }
 0x2a4   : > { %v3023_v40 = vsel %vm2852_vm5, %v3022_v36, %v3009_v21 }
 0x2a7   : > { %v3013_v25 = vpop.permute.xlu1 %3012 }
 0x2a8   : > { %v3024_v43 = vsel %vm2854_vm6, %v3023_v40, %v3013_v25 }
 0x2a9   : > { %v3025_v49 = vsel %vm2856_vm7, %v3024_v43, %v3017_v20 }
 0x2aa   : > { %v3114_v59 = vrot.slane %v3025_v49, 6 }
 0x2af   : > { %v3077_v18 = vpop.permute.xlu0 %3076 }
 0x2b0   : > { %v3103_v32 = vsel %vm2845_vm2, %v3048_v54, %v3077_v18  ;;  %v2855_v54 = vsel %vm2854_vm6, %v2853_v52, %v2839_v11 }
 0x2b1   : > { %v3097_v33 = vpop.permute.xlu1 %3096 }
 0x2b3   : > { %v3081_v23 = vpop.permute.xlu0 %3080 }
 0x2b4   : > { %v3104_v34 = vsel %vm291_vm0, %v3103_v32, %v3081_v23 }
 0x2b5   : > { %v3101_v50 = vpop.permute.xlu1 %3100 }
 0x2b7   : > { %v3089_v26 = vpop.permute.xlu0 %3088 }
 0x2bb   : > { %v3085_v35 = vpop.permute.xlu0 %3084 }
 0x2bc   : > { %v3105_v37 = vsel %vm2848_vm3, %v3104_v34, %v3085_v35 }
 0x2bd   : > { %v3106_v44 = vsel %vm2850_vm4, %v3105_v37, %v3089_v26 }
 0x2bf   : > { %v3093_v45 = vpop.permute.xlu0 %3092 }
 0x2c0   : > { %v3107_v47 = vsel %vm2852_vm5, %v3106_v44, %v3093_v45 }
 0x2c1   : > { %v3108_v51 = vsel %vm2854_vm6, %v3107_v47, %v3097_v33 }
 0x2c2   : > { %v3109_v53 = vsel %vm2856_vm7, %v3108_v51, %v3101_v50 }
 0x2c3   : > { %v2843_v58 = vpop.permute.xlu0 %2842  ;;  %v3117_v61 = vrot.slane %v3109_v53, 5 }
 0x2c4   : > { %v2857_v60 = vsel %vm2856_vm7, %v2855_v54, %v2843_v58 }
 0x2c5   : > { %v3120_v62 = vsel %vm3119_vm8, %v2857_v60, %v3111_v55 }
 0x2c6   : > { %v3122_v56 = vsel %vm3121_vm9, %v3120_v62, %v3114_v59 }
 0x2c7   : > { %v3124_v0 = vsel %vm3123_vm10, %v3122_v56, %v3117_v61 }
 0x2c8   : > { %3804 = vmatpush3.msk.msra.mxu1 %vm3132_vm11, %v3124_v0  ;;  %3126 = vst.msk [vmem:[%s261_s29] sm:$0xf] %vm3125_vm12, %v3124_v0 }
 0x2c9   : > { %3806 = vmatmul.mubr.msk.f32.vlgmr.msra.gmra.mrb[30].mxu1 %vm3128_vm13, %v3127_v63 }
 0x2ca   : > { %4013 = shalt.err (!%p4010_p3)
}
 0x2cb   : > { %s4014_s20 = scalar_lea.hbm %s4631_s12, 64  ;;  %s4018_s9 = scalar_lea.hbm %s4708_s5, 128 }
 0x2cc   : > { %p4015_p4 = scmp.ne.s32.totalorder %s4631_s12, %s4014_s20  ;;  %p4019_p9 = scmp.lt.u32.totalorder %s4631_s12, %s4708_s5 }
 0x2cd   : > { %p4020_p10 = scmp.lt.u32.totalorder %s4018_s9, %s4014_s20  ;;  %p4022_p12 = scmp.lt.u32.totalorder %s4014_s20, %s4631_s12 }
 0x2ce   : > { %p4016_p7 = pnand %p4015_p4, %p4183_p5 }
 0x2cf   : > { %p4021_p11 = por %p4020_p10, %p4019_p9 }
 0x2d0   : > { %p4017_p8 = pneg %p4016_p7 }
 0x2d1   : > { %p4023_p13 = por %p4022_p12, %p4021_p11 }
 0x2d3   : > { %p4024_p0 = pnand %p4023_p13, %p4017_p8 }
 0x2d5   : > { %4027 = shalt.err (!%p4024_p0)
}
 0x2d6   : > { %3944 = dma.vmem_to_hbm [thread:$0]  (%p4183_p5), %s3233_s13, 64, %s4631_s12, %s3214_s14   ;;  %vm3211_vm15 = vcmask 523264  }
 0x2d7   : > { %s3356_s15 = sshll.u32 %s4213_s26, 3  ;;  %s3353_s16 = sshll.u32 %s4612_s18, 3 }
 0x2d8   : > { %s277_s28 = scalar_lea.vmem %s4707_s4, %s3356_s15  ;;  %s3461_s20 = sshll.u32 %s4166_s25, 7 }
 0x2d9   : > { %v3209_v2 = vld [vmem:[%s277_s28] sm:$0xff]  ;;  %s268_s29 = scalar_lea.vmem [#allocation4], %s3353_s16  ;;  %s4660_s13 = scalar_lea.hbm %s4709_s6, %s3461_s20 }
 0x2da   : > { %s3245_s9 = sshll.u32 %s268_s29, 4  ;;  %s3219_s14 = scalar_lea.sflag [#allocation5], %s4612_s18  ;;  %s4662_s9 = int_to_ptr.vmem [resolvable:$true] %s3245_s9 }
 0x2db   : > { %s4028_s10 = scalar_lea.vmem %s4662_s9, 128  ;;  %s4109_s25 = smov [#allocation4]  }
 0x2dc   : > { %p4029_p1 = scmp.ne.s32.totalorder %s4662_s9, %s4028_s10  ;;  %s4032_s11 = sshll.u32 %s4109_s25, 4  ;;  %s4033_s11 = int_to_ptr.vmem [resolvable:$false] %s4032_s11 }
 0x2dd   : > { %s4034_s15 = scalar_lea.vmem %s4033_s11, 256  ;;  %p4035_p4 = scmp.lt.s32.totalorder %s4662_s9, %s4033_s11 }
 0x2de   : > { %p4030_p2 = pnand %p4029_p1, %p4183_p5  ;;  %p4036_p7 = scmp.lt.s32.totalorder %s4034_s15, %s4028_s10 }
 0x2e0   : > { %p4031_p3 = pneg %p4030_p2  ;;  %p4037_p8 = por %p4036_p7, %p4035_p4 }
 0x2e2   : > { %p4038_p9 = pnand %p4037_p8, %p4031_p3 }
 0x39c   : > { %v3202_v1 = vpop.f32.mrb[30].mxu1 }
 0x39d   : > { %vm3206_vm14 = vcmp.ge.f32.partialorder %v3202_v1, 0.0  ;;  %v3207_v3 = vmul.f32 0.2, %v3202_v1  ;;  %v3807_v5 = vpop.f32.mrb[31].mxu1 }
 0x39f   : > { %v3208_v6 = vsel %vm3206_vm14, %v3202_v1, %v3207_v3 }
 0x3a0   : > { %v3210_v4 = vadd.f32 %v3209_v2, %v3208_v6 }
 0x3a2   : > { %3212 = vst.msk [vmem:[%s268_s29] sm:$0xff] %vm3211_vm15, %v3210_v4 }
 0x3a3   : > { %4041 = shalt.err (!%p4038_p9)
}
 0x3a4   : > { %s4042_s18 = scalar_lea.hbm %s4660_s13, 128  ;;  %s4046_s19 = scalar_lea.hbm %s4709_s6, 256 }
 0x3a5   : > { %p4043_p10 = scmp.ne.s32.totalorder %s4660_s13, %s4042_s18  ;;  %p4047_p13 = scmp.lt.u32.totalorder %s4660_s13, %s4709_s6 }
 0x3a6   : > { %p4048_p0 = scmp.lt.u32.totalorder %s4046_s19, %s4042_s18  ;;  %p4050_p2 = scmp.lt.u32.totalorder %s4042_s18, %s4660_s13 }
 0x3a7   : > { %p4044_p11 = pnand %p4043_p10, %p4183_p5 }
 0x3a8   : > { %p4049_p1 = por %p4048_p0, %p4047_p13 }
 0x3a9   : > { %p4045_p12 = pneg %p4044_p11 }
 0x3aa   : > { %p4051_p3 = por %p4050_p2, %p4049_p1 }
 0x3ac   : > { %p4052_p4 = pnand %p4051_p3, %p4045_p12 }
 0x3ae   : > { %4055 = shalt.err (!%p4052_p4)
}
 0x3af   : > { %3945 = dma.vmem_to_hbm [thread:$0]  (%p4183_p5), %s4662_s9, 128, %s4660_s13, %s3219_s14  }
 0x3b0 PF: > { %p3955_p7 = scmp.ge.s32.totalorder %s4094_s24, 2  ;;  %s3257_s29 = sand.u32 1, %s4082_s21  }
 0x3b1   : > { %s3258_s12 = scalar_lea.sflag [#allocation3], %s3257_s29 }
 0x3b2   : > { %p3949_p8 = pnand %p3955_p7, %p4187_p6 }
 0x3b4   : > { %4073 = dma.done.wait (!%p3949_p8), %s3258_s12, 64  }
 0x3b5   : > { %4075 = vsyncadd (!%p3949_p8), %s3258_s12, 4294967232  ;;  %s3267_s26 = scalar_lea.sflag [#allocation5], %s3257_s29 }
 0x3b6   : > { %4077 = dma.done.wait (!%p3949_p8), %s3267_s26, 128  }
 0x3b7   : > { %4079 = vsyncadd (!%p3949_p8), %s3267_s26, 4294967168  ;;  %p20_p5 = scmp.ge.s32.totalorder %s4170_s27, 4   ;;  %s4712_s21 = smov %s4086_s22 }
 0x3b8   : > { %s4713_s22 = smov %s4090_s23  ;;  %s4714_s23 = smov %s4181_s30 }
 0x3b9   : > { %s4715_s24 = smov %s4170_s27  ;;  %22 = sbr.rel (!%p20_p5) target bundleno = 5 (0x5), region = 128 }
 0x3c0   :  { %3272 = vsyncpa [#allocation3], 1 }
 0x3c1   :  { %3274 = vsyncpa [#allocation3 + $0x1], 1 }
 0x3c2   :  { %3275 = vsyncpa [#allocation5], 1 }
 0x3c3   :  { %3277 = vsyncpa [#allocation5 + $0x1], 1 }

</bundles_post_ra>
